<compile_context>
chip_gen: v7x
topology: tpu7x:2x2x1
jax: 0.10.0
libtpu: 0.0.40
codegen_flags: <defaults>
</compile_context>

<pallas_src>
import math
import functools

import jax
import jax.numpy as jnp
from jax.experimental import pallas as pl
from jax.experimental.pallas import tpu as pltpu


def _layer_norm(x, gamma, beta, eps=1e-6):
    # openvqa LayerNorm: unbiased std (ddof=1), eps added to the std.
    # Exact reciprocal here (review: approx recip only in the softmax).
    n = x.shape[-1]
    mean = jnp.mean(x, axis=-1, keepdims=True)
    d = x - mean
    var = jnp.sum(d * d, axis=-1, keepdims=True) * (1.0 / (n - 1))
    inv = 1.0 / (jnp.sqrt(var) + eps)
    return gamma * (d * inv) + beta


def sa_kernel(y_ref, mask_ref,
              wqkv_ref, bqkv_ref,
              wm_ref, bm_ref,
              g1_ref, be1_ref,
              w1_ref, b1_ref, w2_ref, b2_ref,
              g2_ref, be2_ref,
              out_ref,
              att_ref,
              *, num_heads, tb, seq):
    H = y_ref.shape[-1]
    dk = H // num_heads
    tbs = tb * seq

    # bf16 activation slab for the MXU; the f32 y is only re-read later for the
    # residual, so the two copies are not live at the same time.
    y_bf = y_ref[...].reshape(tbs, H).astype(jnp.bfloat16)

    # --- fused QKV projection: one full-width (H, 3H) matmul, f32 accumulation.
    # 1/sqrt(dk) is already folded into Wq / bq by the wrapper.
    qkv = (jnp.dot(y_bf, wqkv_ref[...], preferred_element_type=jnp.float32)
           + bqkv_ref[...])                                       # (TB*S, 3H)
    qkv = qkv.reshape(tb, seq, 3 * H)
    q = qkv[:, :, 0 * H:1 * H].astype(jnp.bfloat16)               # (TB, S, H)
    k = qkv[:, :, 1 * H:2 * H].astype(jnp.bfloat16)
    v = qkv[:, :, 2 * H:3 * H].astype(jnp.bfloat16)

    # masked_fill semantics: replace masked scores with -1e9.  (TB, 1, S)
    masked = mask_ref[...] > 0.0

    # --- per-head attention, batched over the TB batch rows.
    for h in range(num_heads):
        lo = h * dk
        qh = q[:, :, lo:lo + dk]                                  # (TB, S, dk)
        kh = k[:, :, lo:lo + dk]
        vh = v[:, :, lo:lo + dk]

        scores = jnp.einsum("bqd,bkd->bqk", qh, kh,
                            preferred_element_type=jnp.float32)   # (TB, S, S)
        scores = jnp.where(masked, -1e9, scores)

        m = jnp.max(scores, axis=-1, keepdims=True)
        p = jnp.exp(scores - m)
        p = p * pl.reciprocal(jnp.sum(p, axis=-1, keepdims=True), approx=True)
        # attention-map dropout omitted (eval mode)

        head_out = jnp.einsum("bqk,bkd->bqd", p.astype(jnp.bfloat16), vh,
                              preferred_element_type=jnp.float32)  # (TB, S, dk)
        att_ref[:, lo:lo + dk] = head_out.reshape(tbs, dk).astype(jnp.bfloat16)

    # --- single merge matmul with K = H (no per-head accumulate).
    atted = (jnp.dot(att_ref[...], wm_ref[...],
                     preferred_element_type=jnp.float32) + bm_ref[...])

    # --- residual + norm1 ---
    y_f32 = y_ref[...].reshape(tbs, H).astype(jnp.float32)
    z1 = _layer_norm(y_f32 + atted, g1_ref[...], be1_ref[...])

    # --- FFN (Linear -> ReLU -> Linear); dropouts omitted (eval mode) ---
    hmid = jnp.maximum(
        jnp.dot(z1.astype(jnp.bfloat16), w1_ref[...],
                preferred_element_type=jnp.float32) + b1_ref[...], 0.0)
    ff = jnp.dot(hmid.astype(jnp.bfloat16), w2_ref[...],
                 preferred_element_type=jnp.float32) + b2_ref[...]

    # --- residual + norm2 ---
    z2 = _layer_norm(z1 + ff, g2_ref[...], be2_ref[...])

    out_ref[...] = z2.reshape(tb, seq, H).astype(out_ref.dtype)


def sa_forward(y, y_mask, params, *, num_heads, block_batch=1,
               out_dtype=jnp.float32):
    """SA forward.

    For realistic MCAN shapes (S ~ 14-100, H=512, FF=2048) raise block_batch so
    block_batch * S >= ~256-512 (better MXU row fill, fewer ~0.35us grid steps)
    while keeping grid = B // block_batch >= 2 and even so both v7x TensorCores
    get equal work.  out_dtype=jnp.bfloat16 halves HBM writeback if downstream
    layers accept it.
    """
    B, S, H = y.shape
    assert B % block_batch == 0, "block_batch must divide batch"
    assert H % num_heads == 0
    dk = H // num_heads
    inv_sqrt_dk = 1.0 / math.sqrt(dk)
    bf = jnp.bfloat16
    f32 = jnp.float32

    # Fold 1/sqrt(dk) into Wq/bq (in f32, before the bf16 cast) and pack Q/K/V
    # into one (H, 3H) weight so the projection is a single full-width matmul.
    wqkv = jnp.concatenate(
        [params["wq"] * inv_sqrt_dk, params["wk"], params["wv"]],
        axis=1).astype(bf)
    bqkv = jnp.concatenate(
        [params["bq"] * inv_sqrt_dk, params["bk"], params["bv"]],
        axis=1).astype(f32)
    wm = params["wm"].astype(bf)
    w1 = params["w_ff1"].astype(bf)
    w2 = params["w_ff2"].astype(bf)

    # Grid-invariant inputs: constant index_map, so the pipeline keeps the same
    # VMEM block every step (weights DMA'd once, not per grid step).
    # TODO(synk): on v7x, pipeline_mode=pl.Buffered(1) on these specs would
    # single-buffer the resident weights and free ~half their VMEM footprint.
    def const_spec(arr):
        nd = arr.ndim
        return pl.BlockSpec(arr.shape, lambda b, _nd=nd: (0,) * _nd)

    in_specs = [
        pl.BlockSpec((block_batch, S, H), lambda b: (b, 0, 0)),   # y
        pl.BlockSpec((block_batch, 1, S), lambda b: (b, 0, 0)),   # mask
        const_spec(wqkv), const_spec(bqkv),
        const_spec(wm), const_spec(params["bm"]),
        const_spec(params["g1"]), const_spec(params["be1"]),
        const_spec(w1), const_spec(params["b_ff1"]),
        const_spec(w2), const_spec(params["b_ff2"]),
        const_spec(params["g2"]), const_spec(params["be2"]),
    ]

    kernel = functools.partial(sa_kernel, num_heads=num_heads,
                               tb=block_batch, seq=S)

    return pl.pallas_call(
        kernel,
        out_shape=jax.ShapeDtypeStruct((B, S, H), out_dtype),
        grid_spec=pltpu.PrefetchScalarGridSpec(
            num_scalar_prefetch=0,
            grid=(B // block_batch,),
            in_specs=in_specs,
            out_specs=pl.BlockSpec((block_batch, S, H), lambda b: (b, 0, 0)),
            scratch_shapes=[pltpu.VMEM((block_batch * S, H), jnp.bfloat16)],
        ),
        compiler_params=pltpu.CompilerParams(
            dimension_semantics=("parallel",),
            # >= 32 MiB: resident bf16 weights + TB>1 activations at MCAN sizes
            # fit with headroom; v5e's 16 MiB scoped default would be too small.
            vmem_limit_bytes=32 * 1024 * 1024),
    )(y, y_mask,
      wqkv, bqkv, wm, params["bm"],
      params["g1"], params["be1"],
      w1, params["b_ff1"], w2, params["b_ff2"],
      params["g2"], params["be2"])


def sa_reference(y, y_mask, params, *, num_heads):
    """Pure-JAX f32 reference mirroring the PyTorch SA forward (eval mode)."""
    B, S, H = y.shape
    dk = H // num_heads

    def ln(x, g, b, eps=1e-6):
        mean = jnp.mean(x, axis=-1, keepdims=True)
        var = jnp.sum((x - mean) ** 2, axis=-1, keepdims=True) / (H - 1)
        return g * (x - mean) / (jnp.sqrt(var) + eps) + b

    q = y @ params["wq"] + params["bq"]
    k = y @ params["wk"] + params["bk"]
    v = y @ params["wv"] + params["bv"]

    def split(t):  # (B,S,H) -> (B,heads,S,dk)
        return t.reshape(B, S, num_heads, dk).transpose(0, 2, 1, 3)

    qh, kh, vh = split(q), split(k), split(v)
    scores = jnp.einsum("bhqd,bhkd->bhqk", qh, kh) / math.sqrt(dk)
    mask = y_mask[:, None, :, :]                      # (B,1,1,S)
    scores = jnp.where(mask > 0.0, -1e9, scores)
    p = jax.nn.softmax(scores, axis=-1)
    att = jnp.einsum("bhqk,bhkd->bhqd", p, vh).transpose(0, 2, 1, 3).reshape(B, S, H)
    att = att @ params["wm"] + params["bm"]

    z1 = ln(y + att, params["g1"], params["be1"])
    hmid = jax.nn.relu(z1 @ params["w_ff1"] + params["b_ff1"])
    ff = hmid @ params["w_ff2"] + params["b_ff2"]
    return ln(z1 + ff, params["g2"], params["be2"])


def init_params(key, hidden, ff_size):
    ks = jax.random.split(key, 8)
    s = 0.05
    return {
        "wq": s * jax.random.normal(ks[0], (hidden, hidden), jnp.float32),
        "bq": jnp.zeros((1, hidden), jnp.float32),
        "wk": s * jax.random.normal(ks[1], (hidden, hidden), jnp.float32),
        "bk": jnp.zeros((1, hidden), jnp.float32),
        "wv": s * jax.random.normal(ks[2], (hidden, hidden), jnp.float32),
        "bv": jnp.zeros((1, hidden), jnp.float32),
        "wm": s * jax.random.normal(ks[3], (hidden, hidden), jnp.float32),
        "bm": 0.01 * jax.random.normal(ks[4], (1, hidden), jnp.float32),
        "g1": jnp.ones((1, hidden), jnp.float32),
        "be1": jnp.zeros((1, hidden), jnp.float32),
        "w_ff1": s * jax.random.normal(ks[5], (hidden, ff_size), jnp.float32),
        "b_ff1": 0.01 * jax.random.normal(ks[6], (1, ff_size), jnp.float32),
        "w_ff2": s * jax.random.normal(ks[7], (ff_size, hidden), jnp.float32),
        "b_ff2": jnp.zeros((1, hidden), jnp.float32),
        "g2": jnp.ones((1, hidden), jnp.float32),
        "be2": jnp.zeros((1, hidden), jnp.float32),
    }


if __name__ == "__main__":
    # TODO(synk): dropout layers are omitted (inference mode); training-mode
    # dropout would need pltpu.prng_* inside the kernel.
    B, S, H, FF, HEADS, TB = 4, 8, 32, 64, 4, 2   # grid = B//TB = 2 (even -> both v7x TCs busy)

    key = jax.random.PRNGKey(0)
    k_y, k_p = jax.random.split(key)
    y = jax.random.normal(k_y, (B, S, H), jnp.float32)

    # mask: padding at the tail of batches 1 and 3; batches 0/2 fully valid.
    y_mask = jnp.zeros((B, 1, S), jnp.float32)
    y_mask = y_mask.at[1, 0, -2:].set(1.0)
    y_mask = y_mask.at[3, 0, -3:].set(1.0)

    params = init_params(k_p, H, FF)

    out = sa_forward(y, y_mask, params, num_heads=HEADS, block_batch=TB)
    out = jax.block_until_ready(out)

    ref = sa_reference(y, y_mask, params, num_heads=HEADS)
    assert out.shape == (B, S, H)
    max_err = float(jnp.max(jnp.abs(out - ref)))
    # bf16 MXU inputs + approx softmax reciprocal -> bf16-appropriate tolerance.
    assert jnp.allclose(out, ref, atol=3e-2, rtol=3e-2), f"max abs err {max_err}"

    print("KERNEL_OK")
</pallas_src>

<mosaic_0001>
module attributes {stable_mosaic.version = 11 : i64} {
  func.func @sa_kernel(%arg0: i32, %arg1: memref<2x8x32xf32, #tpu.memory_space<vmem>>, %arg2: memref<2x1x8xf32, #tpu.memory_space<vmem>>, %arg3: memref<32x96xbf16, #tpu.memory_space<vmem>>, %arg4: memref<1x96xf32, #tpu.memory_space<vmem>>, %arg5: memref<32x32xbf16, #tpu.memory_space<vmem>>, %arg6: memref<1x32xf32, #tpu.memory_space<vmem>>, %arg7: memref<1x32xf32, #tpu.memory_space<vmem>>, %arg8: memref<1x32xf32, #tpu.memory_space<vmem>>, %arg9: memref<32x64xbf16, #tpu.memory_space<vmem>>, %arg10: memref<1x64xf32, #tpu.memory_space<vmem>>, %arg11: memref<64x32xbf16, #tpu.memory_space<vmem>>, %arg12: memref<1x32xf32, #tpu.memory_space<vmem>>, %arg13: memref<1x32xf32, #tpu.memory_space<vmem>>, %arg14: memref<1x32xf32, #tpu.memory_space<vmem>>, %arg15: memref<2x8x32xf32, #tpu.memory_space<vmem>>, %arg16: memref<16x32xbf16, #tpu.memory_space<vmem>>) attributes {dimension_semantics = [#tpu.dimension_semantics<parallel>], iteration_bounds = array<i64: 2>, scalar_prefetch = 0 : i64, scratch_operands = 1 : i64, tpu.core_type = #tpu.core_type<tc>, window_params = [{transform_indices = @transform_0, window_bounds = array<i64: 2, 8, 32>}, {transform_indices = @transform_1, window_bounds = array<i64: 2, 1, 8>}, {pipeline_mode = #tpu.pipeline_mode<synchronous>, transform_indices = @transform_2, window_bounds = array<i64: 32, 96>}, {pipeline_mode = #tpu.pipeline_mode<synchronous>, transform_indices = @transform_3, window_bounds = array<i64: 1, 96>}, {pipeline_mode = #tpu.pipeline_mode<synchronous>, transform_indices = @transform_4, window_bounds = array<i64: 32, 32>}, {pipeline_mode = #tpu.pipeline_mode<synchronous>, transform_indices = @transform_5, window_bounds = array<i64: 1, 32>}, {pipeline_mode = #tpu.pipeline_mode<synchronous>, transform_indices = @transform_6, window_bounds = array<i64: 1, 32>}, {pipeline_mode = #tpu.pipeline_mode<synchronous>, transform_indices = @transform_7, window_bounds = array<i64: 1, 32>}, {pipeline_mode = #tpu.pipeline_mode<synchronous>, transform_indices = @transform_8, window_bounds = array<i64: 32, 64>}, {pipeline_mode = #tpu.pipeline_mode<synchronous>, transform_indices = @transform_9, window_bounds = array<i64: 1, 64>}, {pipeline_mode = #tpu.pipeline_mode<synchronous>, transform_indices = @transform_10, window_bounds = array<i64: 64, 32>}, {pipeline_mode = #tpu.pipeline_mode<synchronous>, transform_indices = @transform_11, window_bounds = array<i64: 1, 32>}, {pipeline_mode = #tpu.pipeline_mode<synchronous>, transform_indices = @transform_12, window_bounds = array<i64: 1, 32>}, {pipeline_mode = #tpu.pipeline_mode<synchronous>, transform_indices = @transform_13, window_bounds = array<i64: 1, 32>}, {transform_indices = @transform_14, window_bounds = array<i64: 2, 8, 32>}]} {
    %c0 = arith.constant 0 : index
    %c0_0 = arith.constant 0 : index
    %c0_1 = arith.constant 0 : index
    %0 = vector.load %arg1[%c0, %c0_0, %c0_1] : memref<2x8x32xf32, #tpu.memory_space<vmem>>, vector<2x8x32xf32>
    %1 = vector.shape_cast %0 : vector<2x8x32xf32> to vector<16x32xf32>
    %2 = arith.truncf %1 : vector<16x32xf32> to vector<16x32xbf16>
    %c0_2 = arith.constant 0 : index
    %c0_3 = arith.constant 0 : index
    %3 = vector.load %arg3[%c0_2, %c0_3] : memref<32x96xbf16, #tpu.memory_space<vmem>>, vector<32x96xbf16>
    %cst = arith.constant dense<0.000000e+00> : vector<16x96xf32>
    %4 = tpu.matmul %2, %3, %cst {dimension_numbers = #tpu.dot_dimension_numbers<[1], [0], [0], [1], [0, 0, 1, 1], [], []>} : vector<16x32xbf16>, vector<32x96xbf16>, vector<16x96xf32> -> vector<16x96xf32>
    %c0_4 = arith.constant 0 : index
    %c0_5 = arith.constant 0 : index
    %5 = vector.load %arg4[%c0_4, %c0_5] : memref<1x96xf32, #tpu.memory_space<vmem>>, vector<1x96xf32>
    %6 = vector.broadcast %5 : vector<1x96xf32> to vector<16x96xf32>
    %7 = arith.addf %4, %6 : vector<16x96xf32>
    %8 = vector.shape_cast %7 : vector<16x96xf32> to vector<2x8x96xf32>
    %9 = vector.extract_strided_slice %8 {offsets = [0, 0, 0], sizes = [2, 8, 32], strides = [1, 1, 1]} : vector<2x8x96xf32> to vector<2x8x32xf32>
    %10 = arith.truncf %9 : vector<2x8x32xf32> to vector<2x8x32xbf16>
    %11 = vector.extract_strided_slice %8 {offsets = [0, 0, 32], sizes = [2, 8, 32], strides = [1, 1, 1]} : vector<2x8x96xf32> to vector<2x8x32xf32>
    %12 = arith.truncf %11 : vector<2x8x32xf32> to vector<2x8x32xbf16>
    %13 = vector.extract_strided_slice %8 {offsets = [0, 0, 64], sizes = [2, 8, 32], strides = [1, 1, 1]} : vector<2x8x96xf32> to vector<2x8x32xf32>
    %14 = arith.truncf %13 : vector<2x8x32xf32> to vector<2x8x32xbf16>
    %c0_6 = arith.constant 0 : index
    %c0_7 = arith.constant 0 : index
    %c0_8 = arith.constant 0 : index
    %15 = vector.load %arg2[%c0_6, %c0_7, %c0_8] : memref<2x1x8xf32, #tpu.memory_space<vmem>>, vector<2x1x8xf32>
    %cst_9 = arith.constant 0.000000e+00 : f32
    %16 = vector.broadcast %cst_9 : f32 to vector<2x1x8xf32>
    %17 = arith.cmpf ogt, %15, %16 : vector<2x1x8xf32>
    %18 = vector.extract_strided_slice %10 {offsets = [0, 0, 0], sizes = [2, 8, 8], strides = [1, 1, 1]} : vector<2x8x32xbf16> to vector<2x8x8xbf16>
    %19 = vector.extract_strided_slice %12 {offsets = [0, 0, 0], sizes = [2, 8, 8], strides = [1, 1, 1]} : vector<2x8x32xbf16> to vector<2x8x8xbf16>
    %20 = vector.extract_strided_slice %14 {offsets = [0, 0, 0], sizes = [2, 8, 8], strides = [1, 1, 1]} : vector<2x8x32xbf16> to vector<2x8x8xbf16>
    "tpu.trace_start"() <{level = 10 : i32, message = "bqd,bkd->bqk"}> : () -> ()
    %cst_10 = arith.constant dense<0.000000e+00> : vector<2x8x8xf32>
    %21 = tpu.matmul %18, %19, %cst_10 {dimension_numbers = #tpu.dot_dimension_numbers<[2], [2], [1], [1], [0, 0, 0, 1, 1, 1], [0], [0]>} : vector<2x8x8xbf16>, vector<2x8x8xbf16>, vector<2x8x8xf32> -> vector<2x8x8xf32>
    %cst_11 = arith.constant -1.000000e+09 : f32
    "tpu.trace_stop"() : () -> ()
    %22 = vector.shape_cast %17 : vector<2x1x8xi1> to vector<2x1x8xi1>
    %23 = vector.broadcast %22 : vector<2x1x8xi1> to vector<2x8x8xi1>
    %24 = vector.broadcast %cst_11 : f32 to vector<2x8x8xf32>
    %25 = arith.select %23, %24, %21 : vector<2x8x8xi1>, vector<2x8x8xf32>
    %cst_12 = arith.constant dense<0xFF800000> : vector<2x8xf32>
    %26 = vector.multi_reduction <maximumf>, %25, %cst_12 [2] : vector<2x8x8xf32> to vector<2x8xf32>
    %27 = vector.shape_cast %26 : vector<2x8xf32> to vector<2x8x1xf32>
    %28 = vector.broadcast %27 : vector<2x8x1xf32> to vector<2x8x8xf32>
    %29 = arith.subf %25, %28 : vector<2x8x8xf32>
    %30 = math.exp %29 : vector<2x8x8xf32>
    %cst_13 = arith.constant dense<0.000000e+00> : vector<2x8xf32>
    %31 = vector.multi_reduction <add>, %30, %cst_13 [2] : vector<2x8x8xf32> to vector<2x8xf32>
    %32 = vector.shape_cast %31 : vector<2x8xf32> to vector<2x8x1xf32>
    %33 = tpu.reciprocal %32 {approx = true} : vector<2x8x1xf32> -> vector<2x8x1xf32>
    %34 = vector.broadcast %33 : vector<2x8x1xf32> to vector<2x8x8xf32>
    %35 = arith.mulf %30, %34 : vector<2x8x8xf32>
    %36 = arith.truncf %35 : vector<2x8x8xf32> to vector<2x8x8xbf16>
    "tpu.trace_start"() <{level = 10 : i32, message = "bqk,bkd->bqd"}> : () -> ()
    %cst_14 = arith.constant dense<0.000000e+00> : vector<2x8x8xf32>
    %37 = tpu.matmul %36, %20, %cst_14 {dimension_numbers = #tpu.dot_dimension_numbers<[2], [1], [1], [2], [0, 0, 0, 1, 1, 2], [0], [0]>} : vector<2x8x8xbf16>, vector<2x8x8xbf16>, vector<2x8x8xf32> -> vector<2x8x8xf32>
    "tpu.trace_stop"() : () -> ()
    %38 = vector.shape_cast %37 : vector<2x8x8xf32> to vector<16x8xf32>
    %39 = arith.truncf %38 : vector<16x8xf32> to vector<16x8xbf16>
    %c0_15 = arith.constant 0 : index
    %c0_16 = arith.constant 0 : index
    %40 = vector.load %arg16[%c0_15, %c0_16] : memref<16x32xbf16, #tpu.memory_space<vmem>>, vector<16x8xbf16>
    tpu.vector_store %arg16[%c0_15, %c0_16], %39 {strides = array<i32>} : memref<16x32xbf16, #tpu.memory_space<vmem>>, vector<16x8xbf16>,
    %41 = vector.extract_strided_slice %10 {offsets = [0, 0, 8], sizes = [2, 8, 8], strides = [1, 1, 1]} : vector<2x8x32xbf16> to vector<2x8x8xbf16>
    %42 = vector.extract_strided_slice %12 {offsets = [0, 0, 8], sizes = [2, 8, 8], strides = [1, 1, 1]} : vector<2x8x32xbf16> to vector<2x8x8xbf16>
    %43 = vector.extract_strided_slice %14 {offsets = [0, 0, 8], sizes = [2, 8, 8], strides = [1, 1, 1]} : vector<2x8x32xbf16> to vector<2x8x8xbf16>
    "tpu.trace_start"() <{level = 10 : i32, message = "bqd,bkd->bqk"}> : () -> ()
    %cst_17 = arith.constant dense<0.000000e+00> : vector<2x8x8xf32>
    %44 = tpu.matmul %41, %42, %cst_17 {dimension_numbers = #tpu.dot_dimension_numbers<[2], [2], [1], [1], [0, 0, 0, 1, 1, 1], [0], [0]>} : vector<2x8x8xbf16>, vector<2x8x8xbf16>, vector<2x8x8xf32> -> vector<2x8x8xf32>
    %cst_18 = arith.constant -1.000000e+09 : f32
    "tpu.trace_stop"() : () -> ()
    %45 = vector.shape_cast %17 : vector<2x1x8xi1> to vector<2x1x8xi1>
    %46 = vector.broadcast %45 : vector<2x1x8xi1> to vector<2x8x8xi1>
    %47 = vector.broadcast %cst_18 : f32 to vector<2x8x8xf32>
    %48 = arith.select %46, %47, %44 : vector<2x8x8xi1>, vector<2x8x8xf32>
    %cst_19 = arith.constant dense<0xFF800000> : vector<2x8xf32>
    %49 = vector.multi_reduction <maximumf>, %48, %cst_19 [2] : vector<2x8x8xf32> to vector<2x8xf32>
    %50 = vector.shape_cast %49 : vector<2x8xf32> to vector<2x8x1xf32>
    %51 = vector.broadcast %50 : vector<2x8x1xf32> to vector<2x8x8xf32>
    %52 = arith.subf %48, %51 : vector<2x8x8xf32>
    %53 = math.exp %52 : vector<2x8x8xf32>
    %cst_20 = arith.constant dense<0.000000e+00> : vector<2x8xf32>
    %54 = vector.multi_reduction <add>, %53, %cst_20 [2] : vector<2x8x8xf32> to vector<2x8xf32>
    %55 = vector.shape_cast %54 : vector<2x8xf32> to vector<2x8x1xf32>
    %56 = tpu.reciprocal %55 {approx = true} : vector<2x8x1xf32> -> vector<2x8x1xf32>
    %57 = vector.broadcast %56 : vector<2x8x1xf32> to vector<2x8x8xf32>
    %58 = arith.mulf %53, %57 : vector<2x8x8xf32>
    %59 = arith.truncf %58 : vector<2x8x8xf32> to vector<2x8x8xbf16>
    "tpu.trace_start"() <{level = 10 : i32, message = "bqk,bkd->bqd"}> : () -> ()
    %cst_21 = arith.constant dense<0.000000e+00> : vector<2x8x8xf32>
    %60 = tpu.matmul %59, %43, %cst_21 {dimension_numbers = #tpu.dot_dimension_numbers<[2], [1], [1], [2], [0, 0, 0, 1, 1, 2], [0], [0]>} : vector<2x8x8xbf16>, vector<2x8x8xbf16>, vector<2x8x8xf32> -> vector<2x8x8xf32>
    "tpu.trace_stop"() : () -> ()
    %61 = vector.shape_cast %60 : vector<2x8x8xf32> to vector<16x8xf32>
    %62 = arith.truncf %61 : vector<16x8xf32> to vector<16x8xbf16>
    %c0_22 = arith.constant 0 : index
    %c8 = arith.constant 8 : index
    %63 = vector.load %arg16[%c0_22, %c8] : memref<16x32xbf16, #tpu.memory_space<vmem>>, vector<16x8xbf16>
    tpu.vector_store %arg16[%c0_22, %c8], %62 {strides = array<i32>} : memref<16x32xbf16, #tpu.memory_space<vmem>>, vector<16x8xbf16>,
    %64 = vector.extract_strided_slice %10 {offsets = [0, 0, 16], sizes = [2, 8, 8], strides = [1, 1, 1]} : vector<2x8x32xbf16> to vector<2x8x8xbf16>
    %65 = vector.extract_strided_slice %12 {offsets = [0, 0, 16], sizes = [2, 8, 8], strides = [1, 1, 1]} : vector<2x8x32xbf16> to vector<2x8x8xbf16>
    %66 = vector.extract_strided_slice %14 {offsets = [0, 0, 16], sizes = [2, 8, 8], strides = [1, 1, 1]} : vector<2x8x32xbf16> to vector<2x8x8xbf16>
    "tpu.trace_start"() <{level = 10 : i32, message = "bqd,bkd->bqk"}> : () -> ()
    %cst_23 = arith.constant dense<0.000000e+00> : vector<2x8x8xf32>
    %67 = tpu.matmul %64, %65, %cst_23 {dimension_numbers = #tpu.dot_dimension_numbers<[2], [2], [1], [1], [0, 0, 0, 1, 1, 1], [0], [0]>} : vector<2x8x8xbf16>, vector<2x8x8xbf16>, vector<2x8x8xf32> -> vector<2x8x8xf32>
    %cst_24 = arith.constant -1.000000e+09 : f32
    "tpu.trace_stop"() : () -> ()
    %68 = vector.shape_cast %17 : vector<2x1x8xi1> to vector<2x1x8xi1>
    %69 = vector.broadcast %68 : vector<2x1x8xi1> to vector<2x8x8xi1>
    %70 = vector.broadcast %cst_24 : f32 to vector<2x8x8xf32>
    %71 = arith.select %69, %70, %67 : vector<2x8x8xi1>, vector<2x8x8xf32>
    %cst_25 = arith.constant dense<0xFF800000> : vector<2x8xf32>
    %72 = vector.multi_reduction <maximumf>, %71, %cst_25 [2] : vector<2x8x8xf32> to vector<2x8xf32>
    %73 = vector.shape_cast %72 : vector<2x8xf32> to vector<2x8x1xf32>
    %74 = vector.broadcast %73 : vector<2x8x1xf32> to vector<2x8x8xf32>
    %75 = arith.subf %71, %74 : vector<2x8x8xf32>
    %76 = math.exp %75 : vector<2x8x8xf32>
    %cst_26 = arith.constant dense<0.000000e+00> : vector<2x8xf32>
    %77 = vector.multi_reduction <add>, %76, %cst_26 [2] : vector<2x8x8xf32> to vector<2x8xf32>
    %78 = vector.shape_cast %77 : vector<2x8xf32> to vector<2x8x1xf32>
    %79 = tpu.reciprocal %78 {approx = true} : vector<2x8x1xf32> -> vector<2x8x1xf32>
    %80 = vector.broadcast %79 : vector<2x8x1xf32> to vector<2x8x8xf32>
    %81 = arith.mulf %76, %80 : vector<2x8x8xf32>
    %82 = arith.truncf %81 : vector<2x8x8xf32> to vector<2x8x8xbf16>
    "tpu.trace_start"() <{level = 10 : i32, message = "bqk,bkd->bqd"}> : () -> ()
    %cst_27 = arith.constant dense<0.000000e+00> : vector<2x8x8xf32>
    %83 = tpu.matmul %82, %66, %cst_27 {dimension_numbers = #tpu.dot_dimension_numbers<[2], [1], [1], [2], [0, 0, 0, 1, 1, 2], [0], [0]>} : vector<2x8x8xbf16>, vector<2x8x8xbf16>, vector<2x8x8xf32> -> vector<2x8x8xf32>
    "tpu.trace_stop"() : () -> ()
    %84 = vector.shape_cast %83 : vector<2x8x8xf32> to vector<16x8xf32>
    %85 = arith.truncf %84 : vector<16x8xf32> to vector<16x8xbf16>
    %c0_28 = arith.constant 0 : index
    %c16 = arith.constant 16 : index
    %86 = vector.load %arg16[%c0_28, %c16] : memref<16x32xbf16, #tpu.memory_space<vmem>>, vector<16x8xbf16>
    tpu.vector_store %arg16[%c0_28, %c16], %85 {strides = array<i32>} : memref<16x32xbf16, #tpu.memory_space<vmem>>, vector<16x8xbf16>,
    %87 = vector.extract_strided_slice %10 {offsets = [0, 0, 24], sizes = [2, 8, 8], strides = [1, 1, 1]} : vector<2x8x32xbf16> to vector<2x8x8xbf16>
    %88 = vector.extract_strided_slice %12 {offsets = [0, 0, 24], sizes = [2, 8, 8], strides = [1, 1, 1]} : vector<2x8x32xbf16> to vector<2x8x8xbf16>
    %89 = vector.extract_strided_slice %14 {offsets = [0, 0, 24], sizes = [2, 8, 8], strides = [1, 1, 1]} : vector<2x8x32xbf16> to vector<2x8x8xbf16>
    "tpu.trace_start"() <{level = 10 : i32, message = "bqd,bkd->bqk"}> : () -> ()
    %cst_29 = arith.constant dense<0.000000e+00> : vector<2x8x8xf32>
    %90 = tpu.matmul %87, %88, %cst_29 {dimension_numbers = #tpu.dot_dimension_numbers<[2], [2], [1], [1], [0, 0, 0, 1, 1, 1], [0], [0]>} : vector<2x8x8xbf16>, vector<2x8x8xbf16>, vector<2x8x8xf32> -> vector<2x8x8xf32>
    %cst_30 = arith.constant -1.000000e+09 : f32
    "tpu.trace_stop"() : () -> ()
    %91 = vector.shape_cast %17 : vector<2x1x8xi1> to vector<2x1x8xi1>
    %92 = vector.broadcast %91 : vector<2x1x8xi1> to vector<2x8x8xi1>
    %93 = vector.broadcast %cst_30 : f32 to vector<2x8x8xf32>
    %94 = arith.select %92, %93, %90 : vector<2x8x8xi1>, vector<2x8x8xf32>
    %cst_31 = arith.constant dense<0xFF800000> : vector<2x8xf32>
    %95 = vector.multi_reduction <maximumf>, %94, %cst_31 [2] : vector<2x8x8xf32> to vector<2x8xf32>
    %96 = vector.shape_cast %95 : vector<2x8xf32> to vector<2x8x1xf32>
    %97 = vector.broadcast %96 : vector<2x8x1xf32> to vector<2x8x8xf32>
    %98 = arith.subf %94, %97 : vector<2x8x8xf32>
    %99 = math.exp %98 : vector<2x8x8xf32>
    %cst_32 = arith.constant dense<0.000000e+00> : vector<2x8xf32>
    %100 = vector.multi_reduction <add>, %99, %cst_32 [2] : vector<2x8x8xf32> to vector<2x8xf32>
    %101 = vector.shape_cast %100 : vector<2x8xf32> to vector<2x8x1xf32>
    %102 = tpu.reciprocal %101 {approx = true} : vector<2x8x1xf32> -> vector<2x8x1xf32>
    %103 = vector.broadcast %102 : vector<2x8x1xf32> to vector<2x8x8xf32>
    %104 = arith.mulf %99, %103 : vector<2x8x8xf32>
    %105 = arith.truncf %104 : vector<2x8x8xf32> to vector<2x8x8xbf16>
    "tpu.trace_start"() <{level = 10 : i32, message = "bqk,bkd->bqd"}> : () -> ()
    %cst_33 = arith.constant dense<0.000000e+00> : vector<2x8x8xf32>
    %106 = tpu.matmul %105, %89, %cst_33 {dimension_numbers = #tpu.dot_dimension_numbers<[2], [1], [1], [2], [0, 0, 0, 1, 1, 2], [0], [0]>} : vector<2x8x8xbf16>, vector<2x8x8xbf16>, vector<2x8x8xf32> -> vector<2x8x8xf32>
    "tpu.trace_stop"() : () -> ()
    %107 = vector.shape_cast %106 : vector<2x8x8xf32> to vector<16x8xf32>
    %108 = arith.truncf %107 : vector<16x8xf32> to vector<16x8xbf16>
    %c0_34 = arith.constant 0 : index
    %c24 = arith.constant 24 : index
    %109 = vector.load %arg16[%c0_34, %c24] : memref<16x32xbf16, #tpu.memory_space<vmem>>, vector<16x8xbf16>
    tpu.vector_store %arg16[%c0_34, %c24], %108 {strides = array<i32>} : memref<16x32xbf16, #tpu.memory_space<vmem>>, vector<16x8xbf16>,
    %c0_35 = arith.constant 0 : index
    %c0_36 = arith.constant 0 : index
    %110 = vector.load %arg16[%c0_35, %c0_36] : memref<16x32xbf16, #tpu.memory_space<vmem>>, vector<16x32xbf16>
    %c0_37 = arith.constant 0 : index
    %c0_38 = arith.constant 0 : index
    %111 = vector.load %arg5[%c0_37, %c0_38] : memref<32x32xbf16, #tpu.memory_space<vmem>>, vector<32x32xbf16>
    %cst_39 = arith.constant dense<0.000000e+00> : vector<16x32xf32>
    %112 = tpu.matmul %110, %111, %cst_39 {dimension_numbers = #tpu.dot_dimension_numbers<[1], [0], [0], [1], [0, 0, 1, 1], [], []>} : vector<16x32xbf16>, vector<32x32xbf16>, vector<16x32xf32> -> vector<16x32xf32>
    %c0_40 = arith.constant 0 : index
    %c0_41 = arith.constant 0 : index
    %113 = vector.load %arg6[%c0_40, %c0_41] : memref<1x32xf32, #tpu.memory_space<vmem>>, vector<1x32xf32>
    %114 = vector.broadcast %113 : vector<1x32xf32> to vector<16x32xf32>
    %115 = arith.addf %112, %114 : vector<16x32xf32>
    %c0_42 = arith.constant 0 : index
    %c0_43 = arith.constant 0 : index
    %c0_44 = arith.constant 0 : index
    %116 = vector.load %arg1[%c0_42, %c0_43, %c0_44] : memref<2x8x32xf32, #tpu.memory_space<vmem>>, vector<2x8x32xf32>
    %117 = vector.shape_cast %116 : vector<2x8x32xf32> to vector<16x32xf32>
    %118 = arith.addf %117, %115 : vector<16x32xf32>
    %c0_45 = arith.constant 0 : index
    %c0_46 = arith.constant 0 : index
    %119 = vector.load %arg7[%c0_45, %c0_46] : memref<1x32xf32, #tpu.memory_space<vmem>>, vector<1x32xf32>
    %c0_47 = arith.constant 0 : index
    %c0_48 = arith.constant 0 : index
    %120 = vector.load %arg8[%c0_47, %c0_48] : memref<1x32xf32, #tpu.memory_space<vmem>>, vector<1x32xf32>
    %cst_49 = arith.constant dense<0.000000e+00> : vector<16xf32>
    %121 = vector.multi_reduction <add>, %118, %cst_49 [1] : vector<16x32xf32> to vector<16xf32>
    %122 = vector.shape_cast %121 : vector<16xf32> to vector<16x1xf32>
    %cst_50 = arith.constant 3.200000e+01 : f32
    %123 = vector.broadcast %cst_50 : f32 to vector<16x1xf32>
    %124 = arith.divf %122, %123 : vector<16x1xf32>
    %125 = vector.broadcast %124 : vector<16x1xf32> to vector<16x32xf32>
    %126 = arith.subf %118, %125 : vector<16x32xf32>
    %127 = arith.mulf %126, %126 : vector<16x32xf32>
    %cst_51 = arith.constant dense<0.000000e+00> : vector<16xf32>
    %128 = vector.multi_reduction <add>, %127, %cst_51 [1] : vector<16x32xf32> to vector<16xf32>
    %129 = vector.shape_cast %128 : vector<16xf32> to vector<16x1xf32>
    %cst_52 = arith.constant 0.0322580636 : f32
    %130 = vector.broadcast %cst_52 : f32 to vector<16x1xf32>
    %131 = arith.mulf %129, %130 : vector<16x1xf32>
    %132 = math.sqrt %131 : vector<16x1xf32>
    %cst_53 = arith.constant 9.99999997E-7 : f32
    %133 = vector.broadcast %cst_53 : f32 to vector<16x1xf32>
    %134 = arith.addf %132, %133 : vector<16x1xf32>
    %cst_54 = arith.constant 1.000000e+00 : f32
    %135 = vector.broadcast %cst_54 : f32 to vector<16x1xf32>
    %136 = arith.divf %135, %134 : vector<16x1xf32>
    %137 = vector.broadcast %136 : vector<16x1xf32> to vector<16x32xf32>
    %138 = arith.mulf %126, %137 : vector<16x32xf32>
    %139 = vector.broadcast %119 : vector<1x32xf32> to vector<16x32xf32>
    %140 = arith.mulf %139, %138 : vector<16x32xf32>
    %141 = vector.broadcast %120 : vector<1x32xf32> to vector<16x32xf32>
    %142 = arith.addf %140, %141 : vector<16x32xf32>
    %143 = arith.truncf %142 : vector<16x32xf32> to vector<16x32xbf16>
    %c0_55 = arith.constant 0 : index
    %c0_56 = arith.constant 0 : index
    %144 = vector.load %arg9[%c0_55, %c0_56] : memref<32x64xbf16, #tpu.memory_space<vmem>>, vector<32x64xbf16>
    %cst_57 = arith.constant dense<0.000000e+00> : vector<16x64xf32>
    %145 = tpu.matmul %143, %144, %cst_57 {dimension_numbers = #tpu.dot_dimension_numbers<[1], [0], [0], [1], [0, 0, 1, 1], [], []>} : vector<16x32xbf16>, vector<32x64xbf16>, vector<16x64xf32> -> vector<16x64xf32>
    %c0_58 = arith.constant 0 : index
    %c0_59 = arith.constant 0 : index
    %146 = vector.load %arg10[%c0_58, %c0_59] : memref<1x64xf32, #tpu.memory_space<vmem>>, vector<1x64xf32>
    %147 = vector.broadcast %146 : vector<1x64xf32> to vector<16x64xf32>
    %148 = arith.addf %145, %147 : vector<16x64xf32>
    %cst_60 = arith.constant 0.000000e+00 : f32
    %149 = vector.broadcast %cst_60 : f32 to vector<16x64xf32>
    %150 = arith.maximumf %148, %149 : vector<16x64xf32>
    %151 = arith.truncf %150 : vector<16x64xf32> to vector<16x64xbf16>
    %c0_61 = arith.constant 0 : index
    %c0_62 = arith.constant 0 : index
    %152 = vector.load %arg11[%c0_61, %c0_62] : memref<64x32xbf16, #tpu.memory_space<vmem>>, vector<64x32xbf16>
    %cst_63 = arith.constant dense<0.000000e+00> : vector<16x32xf32>
    %153 = tpu.matmul %151, %152, %cst_63 {dimension_numbers = #tpu.dot_dimension_numbers<[1], [0], [0], [1], [0, 0, 1, 1], [], []>} : vector<16x64xbf16>, vector<64x32xbf16>, vector<16x32xf32> -> vector<16x32xf32>
    %c0_64 = arith.constant 0 : index
    %c0_65 = arith.constant 0 : index
    %154 = vector.load %arg12[%c0_64, %c0_65] : memref<1x32xf32, #tpu.memory_space<vmem>>, vector<1x32xf32>
    %155 = vector.broadcast %154 : vector<1x32xf32> to vector<16x32xf32>
    %156 = arith.addf %153, %155 : vector<16x32xf32>
    %157 = arith.addf %142, %156 : vector<16x32xf32>
    %c0_66 = arith.constant 0 : index
    %c0_67 = arith.constant 0 : index
    %158 = vector.load %arg13[%c0_66, %c0_67] : memref<1x32xf32, #tpu.memory_space<vmem>>, vector<1x32xf32>
    %c0_68 = arith.constant 0 : index
    %c0_69 = arith.constant 0 : index
    %159 = vector.load %arg14[%c0_68, %c0_69] : memref<1x32xf32, #tpu.memory_space<vmem>>, vector<1x32xf32>
    %cst_70 = arith.constant dense<0.000000e+00> : vector<16xf32>
    %160 = vector.multi_reduction <add>, %157, %cst_70 [1] : vector<16x32xf32> to vector<16xf32>
    %161 = vector.shape_cast %160 : vector<16xf32> to vector<16x1xf32>
    %cst_71 = arith.constant 3.200000e+01 : f32
    %162 = vector.broadcast %cst_71 : f32 to vector<16x1xf32>
    %163 = arith.divf %161, %162 : vector<16x1xf32>
    %164 = vector.broadcast %163 : vector<16x1xf32> to vector<16x32xf32>
    %165 = arith.subf %157, %164 : vector<16x32xf32>
    %166 = arith.mulf %165, %165 : vector<16x32xf32>
    %cst_72 = arith.constant dense<0.000000e+00> : vector<16xf32>
    %167 = vector.multi_reduction <add>, %166, %cst_72 [1] : vector<16x32xf32> to vector<16xf32>
    %168 = vector.shape_cast %167 : vector<16xf32> to vector<16x1xf32>
    %cst_73 = arith.constant 0.0322580636 : f32
    %169 = vector.broadcast %cst_73 : f32 to vector<16x1xf32>
    %170 = arith.mulf %168, %169 : vector<16x1xf32>
    %171 = math.sqrt %170 : vector<16x1xf32>
    %cst_74 = arith.constant 9.99999997E-7 : f32
    %172 = vector.broadcast %cst_74 : f32 to vector<16x1xf32>
    %173 = arith.addf %171, %172 : vector<16x1xf32>
    %cst_75 = arith.constant 1.000000e+00 : f32
    %174 = vector.broadcast %cst_75 : f32 to vector<16x1xf32>
    %175 = arith.divf %174, %173 : vector<16x1xf32>
    %176 = vector.broadcast %175 : vector<16x1xf32> to vector<16x32xf32>
    %177 = arith.mulf %165, %176 : vector<16x32xf32>
    %178 = vector.broadcast %158 : vector<1x32xf32> to vector<16x32xf32>
    %179 = arith.mulf %178, %177 : vector<16x32xf32>
    %180 = vector.broadcast %159 : vector<1x32xf32> to vector<16x32xf32>
    %181 = arith.addf %179, %180 : vector<16x32xf32>
    %182 = vector.shape_cast %181 : vector<16x32xf32> to vector<2x8x32xf32>
    %c0_76 = arith.constant 0 : index
    %c0_77 = arith.constant 0 : index
    %c0_78 = arith.constant 0 : index
    %183 = vector.load %arg15[%c0_76, %c0_77, %c0_78] : memref<2x8x32xf32, #tpu.memory_space<vmem>>, vector<2x8x32xf32>
    tpu.vector_store %arg15[%c0_76, %c0_77, %c0_78], %182 {strides = array<i32>} : memref<2x8x32xf32, #tpu.memory_space<vmem>>, vector<2x8x32xf32>,
    return
  }
  func.func @transform_0(%arg0: i32) -> (i32, i32, i32) {
    %c0_i32 = arith.constant 0 : i32
    %c0_i32_0 = arith.constant 0 : i32
    %c0_i32_1 = arith.constant 0 : i32
    return %arg0, %c0_i32, %c0_i32_0 : i32, i32, i32
  }
  func.func @transform_1(%arg0: i32) -> (i32, i32, i32) {
    %c0_i32 = arith.constant 0 : i32
    %c0_i32_0 = arith.constant 0 : i32
    %c0_i32_1 = arith.constant 0 : i32
    return %arg0, %c0_i32, %c0_i32_0 : i32, i32, i32
  }
  func.func @transform_2(%arg0: i32) -> (i32, i32) {
    %c0_i32 = arith.constant 0 : i32
    %c0_i32_0 = arith.constant 0 : i32
    %c0_i32_1 = arith.constant 0 : i32
    return %c0_i32, %c0_i32_0 : i32, i32
  }
  func.func @transform_3(%arg0: i32) -> (i32, i32) {
    %c0_i32 = arith.constant 0 : i32
    %c0_i32_0 = arith.constant 0 : i32
    %c0_i32_1 = arith.constant 0 : i32
    return %c0_i32, %c0_i32_0 : i32, i32
  }
  func.func @transform_4(%arg0: i32) -> (i32, i32) {
    %c0_i32 = arith.constant 0 : i32
    %c0_i32_0 = arith.constant 0 : i32
    %c0_i32_1 = arith.constant 0 : i32
    return %c0_i32, %c0_i32_0 : i32, i32
  }
  func.func @transform_5(%arg0: i32) -> (i32, i32) {
    %c0_i32 = arith.constant 0 : i32
    %c0_i32_0 = arith.constant 0 : i32
    %c0_i32_1 = arith.constant 0 : i32
    return %c0_i32, %c0_i32_0 : i32, i32
  }
  func.func @transform_6(%arg0: i32) -> (i32, i32) {
    %c0_i32 = arith.constant 0 : i32
    %c0_i32_0 = arith.constant 0 : i32
    %c0_i32_1 = arith.constant 0 : i32
    return %c0_i32, %c0_i32_0 : i32, i32
  }
  func.func @transform_7(%arg0: i32) -> (i32, i32) {
    %c0_i32 = arith.constant 0 : i32
    %c0_i32_0 = arith.constant 0 : i32
    %c0_i32_1 = arith.constant 0 : i32
    return %c0_i32, %c0_i32_0 : i32, i32
  }
  func.func @transform_8(%arg0: i32) -> (i32, i32) {
    %c0_i32 = arith.constant 0 : i32
    %c0_i32_0 = arith.constant 0 : i32
    %c0_i32_1 = arith.constant 0 : i32
    return %c0_i32, %c0_i32_0 : i32, i32
  }
  func.func @transform_9(%arg0: i32) -> (i32, i32) {
    %c0_i32 = arith.constant 0 : i32
    %c0_i32_0 = arith.constant 0 : i32
    %c0_i32_1 = arith.constant 0 : i32
    return %c0_i32, %c0_i32_0 : i32, i32
  }
  func.func @transform_10(%arg0: i32) -> (i32, i32) {
    %c0_i32 = arith.constant 0 : i32
    %c0_i32_0 = arith.constant 0 : i32
    %c0_i32_1 = arith.constant 0 : i32
    return %c0_i32, %c0_i32_0 : i32, i32
  }
  func.func @transform_11(%arg0: i32) -> (i32, i32) {
    %c0_i32 = arith.constant 0 : i32
    %c0_i32_0 = arith.constant 0 : i32
    %c0_i32_1 = arith.constant 0 : i32
    return %c0_i32, %c0_i32_0 : i32, i32
  }
  func.func @transform_12(%arg0: i32) -> (i32, i32) {
    %c0_i32 = arith.constant 0 : i32
    %c0_i32_0 = arith.constant 0 : i32
    %c0_i32_1 = arith.constant 0 : i32
    return %c0_i32, %c0_i32_0 : i32, i32
  }
  func.func @transform_13(%arg0: i32) -> (i32, i32) {
    %c0_i32 = arith.constant 0 : i32
    %c0_i32_0 = arith.constant 0 : i32
    %c0_i32_1 = arith.constant 0 : i32
    return %c0_i32, %c0_i32_0 : i32, i32
  }
  func.func @transform_14(%arg0: i32) -> (i32, i32, i32) {
    %c0_i32 = arith.constant 0 : i32
    %c0_i32_0 = arith.constant 0 : i32
    %c0_i32_1 = arith.constant 0 : i32
    return %arg0, %c0_i32, %c0_i32_0 : i32, i32, i32
  }
}

</mosaic_0001>

<bundles_post_ra>
// kernel: tpu_custom_call.1
= control target key start
LH: loop header
LB: loop body
LE: loop exit
PB: predicated region body
PF: predicated region fallthrough
CT: control target
= control target key end

     0   :  { %s3136_s0 = inlined_call_operand.vmem [shape: f32[4,8,32], index: 0, kind: input, shape index: {}]   ;;  %s3137_s1 = inlined_call_operand.hbm [shape: f32[4,1,8], index: 1, kind: input, shape index: {}]   ;;  %s3138_s2 = inlined_call_operand.vmem [shape: bf16[32,96], index: 2, kind: input, shape index: {}]   ;;  %s3139_s3 = inlined_call_operand.vmem [shape: f32[1,96], index: 3, kind: input, shape index: {}]   ;;  %s3140_s4 = inlined_call_operand.hbm [shape: bf16[32,32], index: 4, kind: input, shape index: {}]   ;;  %s3141_s5 = inlined_call_operand.vmem [shape: f32[1,32], index: 5, kind: input, shape index: {}]   ;;  %s3142_s6 = inlined_call_operand.vmem [shape: f32[1,32], index: 6, kind: input, shape index: {}]   ;;  %s3143_s7 = inlined_call_operand.vmem [shape: f32[1,32], index: 7, kind: input, shape index: {}]   ;;  %s3144_s8 = inlined_call_operand.hbm [shape: bf16[32,64], index: 8, kind: input, shape index: {}]   ;;  %s3145_s9 = inlined_call_operand.vmem [shape: f32[1,64], index: 9, kind: input, shape index: {}]   ;;  %s3146_s10 = inlined_call_operand.vmem [shape: bf16[64,32], index: 10, kind: input, shape index: {}]   ;;  %s3147_s11 = inlined_call_operand.vmem [shape: f32[1,32], index: 11, kind: input, shape index: {}]   ;;  %s3148_s12 = inlined_call_operand.vmem [shape: f32[1,32], index: 12, kind: input, shape index: {}]   ;;  %s3149_s13 = inlined_call_operand.vmem [shape: f32[1,32], index: 13, kind: input, shape index: {}]   ;;  %s3150_s14 = inlined_call_operand.hbm [shape: f32[4,8,32], index: 14, kind: output, shape index: {}]  }
   0x1   :  { %3157 = sst [smem:[#allocation15_spill]] %s3147_s11 }
   0x2   :  { %3158 = sst [smem:[#allocation16_spill]] %s3148_s12 }
   0x3   :  { %3159 = sst [smem:[#allocation17_spill]] %s3149_s13 }
   0x4   :  { %3160 = sst [smem:[#allocation18_spill]] %s3150_s14 }
   0x5   :  { %19 = vsyncpa [#allocation4], 0 }
   0x6   :  { %21 = vsyncpa [#allocation4 + $0x1], 0 }
   0x7   :  { %22 = vsyncpa [#allocation7], 0 }
   0x8   :  { %23 = vsyncpa [#allocation5], 0 }
   0x9   :  { %25 = vsyncpa [#allocation5 + $0x1], 0  ;;  %s2654_s29 = smov 0   ;;  %s2656_s30 = smov 0  }
   0xa   :  { %s2658_s15 = smov 0   ;;  %s2660_s16 = smov 0  }
   0xb LB: > { %3161 = sst [smem:[#allocation13_spill]] %s2539_s29  ;;  %s2675_s17 = sadd.s32 4294967295, %s2551_s16   ;;  %s2551_s16 = sphi %s2660_s16, %s3185_s16   ;;  %s2547_s15 = sphi %s2658_s15, %s3184_s15   ;;  %s2543_s30 = sphi %s2656_s30, %s3183_s30   ;;  %s2539_s29 = sphi %s2654_s29, %s3182_s29  }
   0xc   : > { %s2010_s18 = sadd.s32 4294967294, %s2551_s16   ;;  %p77_p0 = scmp.ne.s32.totalorder %s2543_s30, %s2539_s29 }
   0xd   : > { %p3154_p1 = scmp.eq.s32.totalorder %s2675_s17, 0  ;;  %p359_p3 = scmp.eq.s32.totalorder %s2010_s18, 1 }
   0xe   : > { %p2011_p5 = scmp.ge.s32.totalorder %s2551_s16, 1  ;;  %p366_p7 = scmp.lt.s32.totalorder %s2551_s16, 3 }
   0xf   : > { %p2684_p4 = por %p3154_p1, %p77_p0  ;;  %p2689_p6 = por %p359_p3, %p77_p0 }
  0x10   : > { %p2694_p8 = pnand %p2011_p5, %p366_p7  ;;  %s2553_s22 = smov [#allocation6]  }
  0x11   : > { %s3162_s19 = scalar_select %p2684_p4, 1, 0 }
  0x12   : > { %s3163_s20 = scalar_select %p2689_p6, 1, 0 }
  0x13   : > { %s384_s23 = sshll.u32 %s2553_s22, 4  ;;  %p2260_p9 = pneg %p2694_p8  ;;  %s2698_s23 = int_to_ptr.vmem [resolvable:$true] %s384_s23 }
  0x14   : > { %3164 = sst [smem:[#allocation14_spill]] %s3163_s20  ;;  %s2554_s25 = smov [#allocation8]  }
  0x15   : > { %p2705_p11 = pnand %p2260_p9, %p3154_p1  ;;  %s406_s26 = sshll.u32 %s2554_s25, 4  ;;  %s2709_s26 = int_to_ptr.vmem [resolvable:$true] %s406_s26 }
  0x16   : > { %s2395_s18 = scalar_lea.hbm %s3140_s4, 256 }
  0x17   : > { %p2396_p12 = scmp.ne.s32.totalorder %s3140_s4, %s2395_s18  ;;  %p2397_p13 = pneg %p2705_p11 }
  0x18   : > { %p2402_p5 = scmp.lt.u32.totalorder %s2395_s18, %s3140_s4 }
  0x19   : > { %p2398_p0 = pnand %p2397_p13, %p2396_p12 }
  0x1b   : > { %p2399_p3 = pneg %p2398_p0 }
  0x1d   : > { %p2404_p7 = pnand %p2402_p5, %p2399_p3 }
  0x1f   : > { %2407 = shalt.err (!%p2404_p7)
}
  0x20   : > { %s2408_s25 = scalar_lea.vmem %s2698_s23, 256  ;;  %p2416_p2 = scmp.lt.s32.totalorder %s2698_s23, %s2698_s23 }
  0x21   : > { %p2409_p9 = scmp.ne.s32.totalorder %s2698_s23, %s2408_s25  ;;  %p2417_p12 = scmp.lt.s32.totalorder %s2408_s25, %s2408_s25 }
  0x23   : > { %p2411_p10 = pnand %p2409_p9, %p2397_p13  ;;  %p2418_p0 = por %p2417_p12, %p2416_p2 }
  0x25   : > { %p2412_p1 = pneg %p2411_p10 }
  0x27   : > { %p2419_p6 = pnand %p2418_p0, %p2412_p1 }
  0x29   : > { %2422 = shalt.err (!%p2419_p6)
}
  0x2a   : > { %s2555_s14 = smov 64   ;;  %s2556_s29 = smov 4  }
  0x2b   : > { %2263 = dma.hbm_to_vmem [thread:$0]  (!%p2705_p11), %s3140_s4, 256, %s2698_s23, [#allocation7], %s2555_s14, %s2555_s14, %s2556_s29  }
  0x2c   : > { %s2423_s22 = scalar_lea.hbm %s3144_s8, 256 }
  0x2d   : > { %p2424_p2 = scmp.ne.s32.totalorder %s3144_s8, %s2423_s22  ;;  %p2430_p10 = scmp.lt.u32.totalorder %s2423_s22, %s3144_s8 }
  0x2f   : > { %p2426_p1 = pnand %p2424_p2, %p2397_p13 }
  0x31   : > { %p2427_p6 = pneg %p2426_p1 }
  0x33   : > { %p2432_p3 = pnand %p2430_p10, %p2427_p6 }
  0x35   : > { %2435 = shalt.err (!%p2432_p3)
}
  0x36   : > { %s2436_s23 = scalar_lea.vmem %s2709_s26, 256  ;;  %p2444_p12 = scmp.lt.s32.totalorder %s2709_s26, %s2709_s26 }
  0x37   : > { %p2437_p5 = scmp.ne.s32.totalorder %s2709_s26, %s2436_s23  ;;  %p2445_p0 = scmp.lt.s32.totalorder %s2436_s23, %s2436_s23 }
  0x39   : > { %p2439_p7 = pnand %p2437_p5, %p2397_p13  ;;  %p2446_p2 = por %p2445_p0, %p2444_p12 }
  0x3b   : > { %p2440_p9 = pneg %p2439_p7 }
  0x3d   : > { %p2447_p1 = pnand %p2446_p2, %p2440_p9 }
  0x3f   : > { %2450 = shalt.err (!%p2447_p1)
}
  0x40   : > { %2266 = dma.hbm_to_vmem [thread:$0]  (!%p2705_p11), %s3144_s8, 256, %s2709_s26, [#allocation7], %s2555_s14, %s2555_s14, %s2556_s29  }
  0x41   : > { %s2764_s13 = sadd.s32 1, %s2551_s16   ;;  %s64_s24 = sadd.s32 1, %s2547_s15 }
  0x42   : > { %s61_s20 = ssub.s32 %s2551_s16, %s2764_s13  ;;  %p71_p13 = scmp.ne.s32.totalorder %s2547_s15, %s2543_s30 }
  0x43   : > { %p62_p6 = scmp.eq.s32.totalorder %s61_s20, 0  ;;  %p72_p10 = scmp.eq.s32.totalorder %s2551_s16, 0 }
  0x44   : > { %p3167_p3 = scmp.eq.s32.totalorder %s2675_s17, 1  ;;  %p2277_p7 = scmp.lt.s32.totalorder %s2551_s16, 2 }
  0x45   : > { %s2780_s28 = scalar_select %p62_p6, %s2547_s15, %s64_s24  }
  0x46   : > { %p2774_p5 = por %p3167_p3, %p71_p13  ;;  %p73_p9 = por %p72_p10, %p71_p13 }
  0x47   : > { %s444_s18 = sand.u32 1, %s2547_s15   ;;  %s2068_s26 = sshll.u32 %s2551_s16, 5 }
  0x48   : > { %s3168_s27 = scalar_select %p2774_p5, 1, 0 }
  0x49   : > { %s2015_s22 = sshll.u32 %s444_s18, 1  ;;  %s2787_s25 = scalar_lea.hbm %s3137_s1, %s2068_s26 }
  0x4a   : > { %s448_s23 = scalar_lea.vmem [#allocation3], %s2015_s22  ;;  %p2791_p11 = pnand %p2277_p7, %p73_p9 }
  0x4b   : > { %s455_s11 = sshll.u32 %s448_s23, 4  ;;  %s2795_s24 = scalar_lea.sflag [#allocation4], %s444_s18  ;;  %s2789_s11 = int_to_ptr.vmem [resolvable:$true] %s455_s11 }
  0x4c   : > { %s2451_s20 = scalar_lea.hbm %s2787_s25, 32  ;;  %p2453_p0 = pneg %p2791_p11 }
  0x4d   : > { %p2452_p12 = scmp.ne.s32.totalorder %s2787_s25, %s2451_s20  ;;  %s2456_s14 = scalar_lea.hbm %s3137_s1, 64 }
  0x4e   : > { %p2457_p13 = scmp.lt.u32.totalorder %s2787_s25, %s3137_s1  ;;  %p2458_p6 = scmp.lt.u32.totalorder %s2456_s14, %s2451_s20 }
  0x4f   : > { %p2454_p2 = pnand %p2453_p0, %p2452_p12  ;;  %p2460_p3 = scmp.lt.u32.totalorder %s2451_s20, %s2787_s25 }
  0x50   : > { %p2459_p10 = por %p2458_p6, %p2457_p13 }
  0x51   : > { %p2455_p1 = pneg %p2454_p2 }
  0x52   : > { %p2461_p7 = por %p2460_p3, %p2459_p10 }
  0x54   : > { %p2462_p9 = pnand %p2461_p7, %p2455_p1 }
  0x56   : > { %2465 = shalt.err (!%p2462_p9)
}
  0x57   : > { %s2466_s18 = scalar_lea.vmem %s2789_s11, 32  ;;  %s2557_s22 = smov [#allocation3]  }
  0x58   : > { %p2467_p12 = scmp.ne.s32.totalorder %s2789_s11, %s2466_s18  ;;  %s2471_s26 = sshll.u32 %s2557_s22, 4  ;;  %s2472_s26 = int_to_ptr.vmem [resolvable:$false] %s2471_s26 }
  0x59   : > { %s2473_s29 = scalar_lea.vmem %s2472_s26, 64  ;;  %p2474_p4 = scmp.lt.s32.totalorder %s2789_s11, %s2472_s26 }
  0x5a   : > { %p2469_p2 = pnand %p2467_p12, %p2453_p0  ;;  %p2475_p13 = scmp.lt.s32.totalorder %s2473_s29, %s2466_s18 }
  0x5c   : > { %p2470_p5 = pneg %p2469_p2  ;;  %p2476_p6 = por %p2475_p13, %p2474_p4 }
  0x5e   : > { %p2477_p10 = pnand %p2476_p6, %p2470_p5 }
  0x60   : > { %2480 = shalt.err (!%p2477_p10)
}
  0x61   : > { %s2558_s20 = smov 16   ;;  %s2559_s14 = smov 1  }
  0x62   : > { %2270 = dma.hbm_to_vmem [thread:$0]  (!%p2791_p11), %s2787_s25, 32, %s2789_s11, %s2795_s24, %s2558_s20, %s2558_s20, %s2559_s14  }
  0x63   : > { %467 = sbr.rel (%p2694_p8) target bundleno = 4269 (0x10ad), region = 76  ;;  %s2826_s23 = sand.u32 (!%p2694_p8), 1, %s2543_s30  }
  0x64   : > { %s2019_s18 = sshll.u32 (!%p2694_p8), %s2826_s23, 1  ;;  %s470_s22 = scalar_lea.sflag (!%p2694_p8), [#allocation4], %s2826_s23 }
  0x65   : > { %s2830_s26 = scalar_lea.vmem (!%p2694_p8), [#allocation3], %s2019_s18  ;;  %p3170_p4 = scmp.ne.s32.totalorder (!%p2694_p8), %s3162_s19, 0 }
  0x6a   : > { %2526 = dma.done.wait (%p3170_p4), %s470_s22, 32  }
  0x6b   : > { %2528 = vsyncadd (%p3170_p4), %s470_s22, 4294967264  ;;  %p3171_p5 = scmp.eq.s32.totalorder %s2675_s17, 0 }
  0x6d   : > { %2530 = dma.done.wait (%p3171_p5), [#allocation7], 512   ;;  %p3172_p8 = pmov %p3171_p5 }
  0x6e   : > { %s2023_s21 = sshll.u32 %s2675_s17, 1  ;;  %v2560_v0 = vmov 0.0   ;;  %vm2561_vm0 = vmmov 0   ;;  %v2337_v1 = vld [vmem:[%s3138_s2] sm:$0xff]   ;;  %v2338_v2 = vld [vmem:[%s3138_s2 + $0x8] sm:$0xff]   ;;  %vm566_vm1 = vcmask 261120   ;;  %v718_v19 = vlaneseq }
  0x6f   : > { %2532 = vsyncadd (%p3172_p8), [#allocation7], 4294966784  ;;  %2116 = vmatprep.subr.bf16.mxu0 %v2560_v0  ;;  %2120 = vmatprep.mubr.msk.bf16.mxu0 %vm2561_vm0, %v2560_v0  ;;  %p532_p11 = scmp.lt.s32.totalorder %s2023_s21, 3  ;;  %v2025_v6 = vld [vmem:[%s3139_s3] ss:$0 sm:$0xff]  ;;  %vm620_vm2 = vcmask 64512  }
  0x70   : > { %2124 = vmatprep.subr.bf16.mxu1 %v2560_v0  ;;  %2126 = vmatprep.mubr.msk.bf16.mxu1 %vm2561_vm0, %v2560_v0  ;;  %v613_v20 = vld [vmem:[%s2830_s26] sm:$0x1]  ;;  %v719_v21 = vshrl.u32 %v718_v19, 7  ;;  %v614_v22 = vld [vmem:[%s2830_s26 + $0x1] sm:$0x1]  ;;  %v2563_v24 = vmov 0  }
  0x71   : > { %s3187_s21 = smov (!%p532_p11, %s2023_s21), 3  ;;  %2117 = vmatpush3.bf16.msra.mxu0 %v2337_v1  ;;  %vm615_vm3 = vcmp.gt.f32.partialorder %v613_v20, 0.0  ;;  %vm616_vm4 = vcmp.gt.f32.partialorder %v614_v22, 0.0  ;;  %s2564_s26 = smov 64   ;;  %vm759_vm7 = vcmask 1043456   ;;  %vm1080_vm8 = vcmask 130112  }
  0x72   : > { %s2024_s19 = sshll.u32 %s3187_s21, 3  ;;  %2118 = vmatprep.subr.bf16.mxu0 %v2560_v0  ;;  %s2562_s21 = smov 96   ;;  %v720_v23 = vsub.s32 0, %v719_v21  ;;  %v716_v25 = vsel %vm615_vm3, 1, %v2563_v24  ;;  %v717_v27 = vsel %vm616_vm4, 1, %v2563_v24  ;;  %vm1309_vm9 = vcmask 195712  }
  0x73   : > { %s535_s12 = scalar_lea.vmem %s3136_s0, %s2024_s19  ;;  %s2565_s19 = smov 88   ;;  %vm1538_vm10 = vcmask 261312   ;;  %vm1783_vm15 = vcmask 523264  }
  0x74   : > { %v2856_v3 = vld [vmem:[%s535_s12] sm:$0xff]  ;;  %v2858_v4 = vld [vmem:[%s535_s12 + $0x8] sm:$0xff]  ;;  %v2890_v26 = vrot.slane %v716_v25, %v720_v23  ;;  %v2893_v28 = vrot.slane %v717_v27, %v720_v23  ;;  %s2566_s25 = smov 120   ;;  %s2567_s11 = smov 56  }
  0x75   : > { %v542_v5 = vpack.c.bf16 %v2858_v4, %v2856_v3  ;;  %2119 = vmatpush3.bf16.msra.mxu0 %v2338_v2  ;;  %s2568_s12 = smov 80   ;;  %s2569_s24 = smov 112  }
  0x76   : > { %2130 = vmatprep.subr.bf16.mxu0 %v2560_v0  ;;  %vm726_vm5 = vcmp.eq.s32.totalorder %v2890_v26, 1  ;;  %vm727_vm6 = vcmp.eq.s32.totalorder %v2893_v28, 1  ;;  %s2570_s29 = smov 48   ;;  %s2571_s20 = smov 72  }
  0x77   : > { %s2572_s14 = smov 104   ;;  %s2573_s18 = smov 40  }
  0x78   : > { %2121 = vmatmul.mubr.msk.bf16.vlgmr.msra.gmra.mrb[0].mxu0 %vm566_vm1, %v542_v5  ;;  %s2574_s22 = smov 8   ;;  %p3177_p1 = scmp.ne.s32.totalorder %s3168_s27, 0 }
  0x79   : > { %2132 = vmatprep.mubr.msk.bf16.mxu0 %vm2561_vm0, %v2560_v0 }
 0x14b   : > { %v604_v7 = vpop.f32.mrb[0].mxu0 }
 0x14c   : > { %v605_v8 = vadd.f32 %v2025_v6, %v604_v7  ;;  %v2122_v9 = vpop.f32.mrb[1].mxu0 }
 0x14d   : > { %v607_v10 = vpop.f32.mrb[2].mxu0 }
 0x14e   : > { %v2870_v11 = vpack.c.bf16 %v605_v8, %v605_v8  ;;  %v608_v12 = vadd.f32 %v2025_v6, %v607_v10  ;;  %v2123_v13 = vpop.f32.mrb[3].mxu0 }
 0x150   : > { %618 = vrot.lane.b32.xlu0 %v2870_v11, %s2562_s21  ;;  %v2873_v14 = vpack.c.bf16 %v608_v12, %v608_v12 }
 0x154   : > { %668 = vrot.lane.b32.xlu0 %v2873_v14, %s2562_s21  ;;  %s2575_s21 = smov 16  }
 0x1c2   : > { %v619_v15 = vpop.permute.xlu0 %618 }
 0x1c3   : > { %v625_v16 = vsel %vm620_vm2, %v619_v15, 0 }
 0x1c4   : > { %2125 = vmatpush3.bf16.xpose.msra.mxu1 %v625_v16 }
 0x1c5   : > { %2136 = vmatprep.subr.bf16.mxu1 %v2560_v0 }
 0x1c6   : > { %v669_v17 = vpop.permute.xlu0 %668 }
 0x1c7   : > { %v674_v18 = vsel %vm620_vm2, %v669_v17, 0 }
 0x1c8   : > { %2131 = vmatpush3.bf16.xpose.msra.mxu0 %v674_v18 }
 0x1c9   : > { %2142 = vmatprep.subr.bf16.mxu0 %v2560_v0 }
 0x1cb   : > { %2127 = vmatmul.mubr.msk.bf16.vlgmr.msra.gmra.mrb[0].mxu1 %vm620_vm2, %v2870_v11 }
 0x1cc   : > { %2138 = vmatprep.mubr.msk.bf16.mxu1 %vm2561_vm0, %v2560_v0 }
 0x1cf   : > { %2133 = vmatmul.mubr.msk.bf16.vlgmr.msra.gmra.mrb[4].mxu0 %vm620_vm2, %v2873_v14 }
 0x1d0   : > { %2144 = vmatprep.mubr.msk.bf16.mxu0 %vm2561_vm0, %v2560_v0 }
 0x29e   : > { %v661_v29 = vpop.f32.mrb[0].mxu1 }
 0x29f   : > { %v728_v30 = vsel %vm726_vm5, -1e+09, %v661_v29  ;;  %v2128_v31 = vpop.f32.mrb[1].mxu1 }
 0x2a0   : > { %v664_v32 = vpop.f32.mrb[2].mxu1  ;;  %v730_v33 = vsel %vm620_vm2, %v728_v30, -inf }
 0x2a1   : > { %731 = vmax.xlane.f32.xlu1 %v730_v33  ;;  %v2129_v34 = vpop.f32.mrb[3].mxu1 }
 0x2a2   : > { %v710_v35 = vpop.f32.mrb[4].mxu0 }
 0x2a3   : > { %v729_v36 = vsel %vm727_vm6, -1e+09, %v710_v35  ;;  %v2134_v37 = vpop.f32.mrb[5].mxu0 }
 0x2a4   : > { %v713_v38 = vpop.f32.mrb[6].mxu0  ;;  %v733_v39 = vsel %vm620_vm2, %v729_v36, -inf }
 0x2a5   : > { %734 = vmax.xlane.f32.xlu1 %v733_v39  ;;  %v2135_v40 = vpop.f32.mrb[7].mxu0 }
 0x2b6   : > { %754 = vrot.lane.b32.xlu1 %v2870_v11, %s2564_s26 }
 0x2ba   : > { %803 = vrot.lane.b32.xlu1 %v2873_v14, %s2564_s26  ;;  %s2576_s26 = smov 24  }
 0x2be   : > { %855 = vrot.lane.b32.xlu1 %v2870_v11, %s2565_s19 }
 0x32e   : > { %v732_v41 = vpop.xlane.xlu1 %731 }
 0x32f   : > { %v736_v42 = vsub.f32 %v728_v30, %v732_v41 }
 0x331   : > { %v738_v43 = vmul.f32 1.442695, %v736_v42 }
 0x332   : > { %v735_v44 = vpop.xlane.xlu1 %734 }
 0x333   : > { %2347 = vpow2.f32 %v738_v43  ;;  %v737_v45 = vsub.f32 %v729_v36, %v735_v44 }
 0x335   : > { %v740_v46 = vmul.f32 1.442695, %v737_v45 }
 0x336   : > { %v755_v47 = vpop.permute.xlu1 %754 }
 0x337   : > { %2349 = vpow2.f32 %v740_v46  ;;  %v761_v48 = vsel %vm759_vm7, %v755_v47, 0 }
 0x338   : > { %2137 = vmatpush3.bf16.msra.mxu1 %v761_v48 }
 0x339   : > { %2148 = vmatprep.subr.bf16.mxu1 %v2560_v0 }
 0x33a   : > { %v804_v49 = vpop.permute.xlu1 %803 }
 0x33b   : > { %v809_v50 = vsel %vm759_vm7, %v804_v49, 0 }
 0x33c   : > { %2143 = vmatpush3.bf16.msra.mxu0 %v809_v50 }
 0x33d   : > { %v2348_v51 = vpop.eup %2347  ;;  %2154 = vmatprep.subr.bf16.mxu0 %v2560_v0 }
 0x33e   : > { %v742_v52 = vsel %vm620_vm2, %v2348_v51, 0.0  ;;  %v856_v55 = vpop.permute.xlu1 %855 }
 0x33f   : > { %743 = vadd.xlane.f32.xlu0 %v742_v52  ;;  %v861_v62 = vsel %vm620_vm2, %v856_v55, 0 }
 0x341   : > { %v2350_v53 = vpop.eup %2349 }
 0x342   : > { %v745_v54 = vsel %vm620_vm2, %v2350_v53, 0.0 }
 0x343   : > { %746 = vadd.xlane.f32.xlu1 %v745_v54 }
 0x354   : > { %905 = vrot.lane.b32.xlu1 %v2873_v14, %s2565_s19  ;;  %s3174_s19 = sld [smem:[#allocation16_spill]] }
 0x355   : > { %853 = vrot.lane.b32.xlu0 %v2870_v11, %s2566_s25 }
 0x358   : > { %903 = vrot.lane.b32.xlu1 %v2873_v14, %s2566_s25 }
 0x3cc   : > { %v744_v56 = vpop.xlane.xlu0 %743 }
 0x3cd   : > { %2351 = vrcp.f32 %v744_v56 }
 0x3d0   : > { %v747_v57 = vpop.xlane.xlu1 %746  ;;  %v854_v6 = vpop.permute.xlu0 %853 }
 0x3d1   : > { %2353 = vrcp.f32 %v747_v57 }
 0x3d4   : > { %v906_v1 = vpop.permute.xlu1 %905 }
 0x3d5   : > { %v911_v5 = vsel %vm620_vm2, %v906_v1, 0 }
 0x3d7   : > { %v2352_v58 = vpop.eup %2351 }
 0x3d8   : > { %v750_v59 = vmul.f32 %v2352_v58, %v2348_v51  ;;  %v904_v7 = vpop.permute.xlu1 %903 }
 0x3da   : > { %v752_v60 = vpack.c.bf16 %v750_v59, %v750_v59 }
 0x3db   : > { %v2354_v61 = vpop.eup %2353 }
 0x3dc   : > { %v751_v63 = vmul.f32 %v2354_v61, %v2350_v53  ;;  %2139 = vmatmul.mubr.msk.bf16.vlgmr.msra.gmra.mrb[4].mxu1 %vm620_vm2, %v752_v60 }
 0x3dd   : > { %2149 = vmatpush3.bf16.xpose.msra.mxu1 %v861_v62  ;;  %2150 = vmatprep.mubr.msk.bf16.mxu1 %vm2561_vm0, %v2560_v0 }
 0x3de   : > { %v753_v2 = vpack.c.bf16 %v751_v63, %v751_v63  ;;  %2160 = vmatprep.subr.bf16.mxu1 %v2560_v0 }
 0x3e0   : > { %2145 = vmatmul.mubr.msk.bf16.vlgmr.msra.gmra.mrb[8].mxu0 %vm620_vm2, %v753_v2 }
 0x3e1   : > { %2155 = vmatpush3.bf16.xpose.msra.mxu0 %v911_v5  ;;  %2156 = vmatprep.mubr.msk.bf16.mxu0 %vm2561_vm0, %v2560_v0 }
 0x3e2   : > { %2166 = vmatprep.subr.bf16.mxu0 %v2560_v0 }
 0x3e4   : > { %2151 = vmatmul.mubr.msk.bf16.vlgmr.msra.gmra.mrb[8].mxu1 %vm620_vm2, %v854_v6 }
 0x3e5   : > { %2162 = vmatprep.mubr.msk.bf16.mxu1 %vm2561_vm0, %v2560_v0 }
 0x3e8   : > { %2157 = vmatmul.mubr.msk.bf16.vlgmr.msra.gmra.mrb[12].mxu0 %vm620_vm2, %v904_v7 }
 0x3e9   : > { %2168 = vmatprep.mubr.msk.bf16.mxu0 %vm2561_vm0, %v2560_v0 }
 0x4af   : > { %v797_v8 = vpop.f32.mrb[4].mxu1 }
 0x4b0   : > { %v2140_v9 = vpop.f32.mrb[5].mxu1 }
 0x4b1   : > { %v800_v10 = vpop.f32.mrb[6].mxu1 }
 0x4b2   : > { %v2141_v12 = vpop.f32.mrb[7].mxu1 }
 0x4b3   : > { %v845_v13 = vpop.f32.mrb[8].mxu0 }
 0x4b4   : > { %v851_v15 = vpack.c.bf16 %v845_v13, %v797_v8  ;;  %v2146_v16 = vpop.f32.mrb[9].mxu0 }
 0x4b5   : > { %v848_v17 = vpop.f32.mrb[10].mxu0 }
 0x4b6   : > { %852 = vst.msk [vmem:[#allocation2] sm:$0xff] %vm620_vm2, %v851_v15  ;;  %v2147_v18 = vpop.f32.mrb[11].mxu0 }
 0x4b7   : > { %v897_v19 = vpop.f32.mrb[8].mxu1 }
 0x4b8   : > { %v953_v20 = vsel %vm726_vm5, -1e+09, %v897_v19  ;;  %v2152_v21 = vpop.f32.mrb[9].mxu1 }
 0x4b9   : > { %v900_v22 = vpop.f32.mrb[10].mxu1  ;;  %v955_v23 = vsel %vm620_vm2, %v953_v20, -inf }
 0x4ba   : > { %956 = vmax.xlane.f32.xlu1 %v955_v23  ;;  %v2153_v24 = vpop.f32.mrb[11].mxu1 }
 0x4bb   : > { %v947_v25 = vpop.f32.mrb[12].mxu0 }
 0x4bc   : > { %v954_v27 = vsel %vm727_vm6, -1e+09, %v947_v25  ;;  %v2158_v29 = vpop.f32.mrb[13].mxu0 }
 0x4bd   : > { %v950_v30 = vpop.f32.mrb[14].mxu0  ;;  %v958_v31 = vsel %vm620_vm2, %v954_v27, -inf }
 0x4be   : > { %959 = vmax.xlane.f32.xlu0 %v958_v31  ;;  %v2159_v32 = vpop.f32.mrb[15].mxu0 }
 0x4cb   : > { %979 = vrot.lane.b32.xlu1 %v2870_v11, %s2567_s11 }
 0x4cf   : > { %1084 = vrot.lane.b32.xlu1 %v2870_v11, %s2568_s12 }
 0x4d4   : > { %1027 = vrot.lane.b32.xlu0 %v2873_v14, %s2567_s11 }
 0x4d8   : > { %1082 = vrot.lane.b32.xlu0 %v2870_v11, %s2569_s24 }
 0x547   : > { %v957_v33 = vpop.xlane.xlu1 %956 }
 0x548   : > { %v961_v34 = vsub.f32 %v953_v20, %v957_v33 }
 0x54a   : > { %v963_v35 = vmul.f32 1.442695, %v961_v34 }
 0x54b   : > { %v980_v36 = vpop.permute.xlu1 %979  ;;  %v960_v37 = vpop.xlane.xlu0 %959 }
 0x54c   : > { %2355 = vpow2.f32 %v963_v35  ;;  %v985_v38 = vsel %vm759_vm7, %v980_v36, 0  ;;  %v962_v39 = vsub.f32 %v954_v27, %v960_v37 }
 0x54d   : > { %2161 = vmatpush3.bf16.msra.mxu1 %v985_v38 }
 0x54e   : > { %v965_v40 = vmul.f32 1.442695, %v962_v39  ;;  %2172 = vmatprep.subr.bf16.mxu1 %v2560_v0 }
 0x54f   : > { %v1028_v41 = vpop.permute.xlu0 %1027  ;;  %v1085_v47 = vpop.permute.xlu1 %1084 }
 0x550   : > { %2357 = vpow2.f32 %v965_v40  ;;  %v1033_v42 = vsel %vm759_vm7, %v1028_v41, 0  ;;  %v1090_v54 = vsel %vm620_vm2, %v1085_v47, 0 }
 0x551   : > { %2167 = vmatpush3.bf16.msra.mxu0 %v1033_v42 }
 0x552   : > { %2178 = vmatprep.subr.bf16.mxu0 %v2560_v0 }
 0x553   : > { %v1083_v59 = vpop.permute.xlu0 %1082 }
 0x556   : > { %v2356_v43 = vpop.eup %2355 }
 0x557   : > { %v967_v44 = vsel %vm620_vm2, %v2356_v43, 0.0 }
 0x558   : > { %968 = vadd.xlane.f32.xlu1 %v967_v44 }
 0x55a   : > { %v2358_v45 = vpop.eup %2357 }
 0x55b   : > { %v970_v46 = vsel %vm620_vm2, %v2358_v45, 0.0 }
 0x55c   : > { %971 = vadd.xlane.f32.xlu1 %v970_v46 }
 0x56d   : > { %1134 = vrot.lane.b32.xlu1 %v2873_v14, %s2568_s12  ;;  %s3175_s12 = sld [smem:[#allocation17_spill]] }
 0x571   : > { %1132 = vrot.lane.b32.xlu1 %v2873_v14, %s2569_s24  ;;  %s2069_s24 = sshll.u32 %s2675_s17, 8  ;;  %s1893_s17 = scalar_lea.sflag [#allocation5], %s2826_s23 }
 0x5e5   : > { %v969_v48 = vpop.xlane.xlu1 %968 }
 0x5e6   : > { %2359 = vrcp.f32 %v969_v48 }
 0x5e9   : > { %v972_v49 = vpop.xlane.xlu1 %971 }
 0x5ea   : > { %2361 = vrcp.f32 %v972_v49 }
 0x5ed   : > { %v1135_v56 = vpop.permute.xlu1 %1134 }
 0x5ee   : > { %v1140_v58 = vsel %vm620_vm2, %v1135_v56, 0 }
 0x5f0   : > { %v2360_v50 = vpop.eup %2359 }
 0x5f1   : > { %v975_v51 = vmul.f32 %v2360_v50, %v2356_v43  ;;  %v1133_v60 = vpop.permute.xlu1 %1132 }
 0x5f3   : > { %v977_v52 = vpack.c.bf16 %v975_v51, %v975_v51 }
 0x5f4   : > { %v2362_v53 = vpop.eup %2361 }
 0x5f5   : > { %v976_v55 = vmul.f32 %v2362_v53, %v2358_v45  ;;  %2163 = vmatmul.mubr.msk.bf16.vlgmr.msra.gmra.mrb[12].mxu1 %vm620_vm2, %v977_v52 }
 0x5f6   : > { %2173 = vmatpush3.bf16.xpose.msra.mxu1 %v1090_v54  ;;  %2174 = vmatprep.mubr.msk.bf16.mxu1 %vm2561_vm0, %v2560_v0 }
 0x5f7   : > { %v978_v57 = vpack.c.bf16 %v976_v55, %v976_v55  ;;  %2184 = vmatprep.subr.bf16.mxu1 %v2560_v0 }
 0x5f9   : > { %2169 = vmatmul.mubr.msk.bf16.vlgmr.msra.gmra.mrb[16].mxu0 %vm620_vm2, %v978_v57 }
 0x5fa   : > { %2179 = vmatpush3.bf16.xpose.msra.mxu0 %v1140_v58  ;;  %2180 = vmatprep.mubr.msk.bf16.mxu0 %vm2561_vm0, %v2560_v0 }
 0x5fb   : > { %2190 = vmatprep.subr.bf16.mxu0 %v2560_v0 }
 0x5fd   : > { %2175 = vmatmul.mubr.msk.bf16.vlgmr.msra.gmra.mrb[16].mxu1 %vm620_vm2, %v1083_v59 }
 0x5fe   : > { %2186 = vmatprep.mubr.msk.bf16.mxu1 %vm2561_vm0, %v2560_v0 }
 0x601   : > { %2181 = vmatmul.mubr.msk.bf16.vlgmr.msra.gmra.mrb[20].mxu0 %vm620_vm2, %v1133_v60 }
 0x602   : > { %2192 = vmatprep.mubr.msk.bf16.mxu0 %vm2561_vm0, %v2560_v0 }
 0x6c8   : > { %v2965_v61 = vpop.f32.mrb[12].mxu1 }
 0x6c9   : > { %v2164_v62 = vpop.f32.mrb[13].mxu1 }
 0x6ca   : > { %v1024_v63 = vpop.f32.mrb[14].mxu1 }
 0x6cb   : > { %v2165_v1 = vpop.f32.mrb[15].mxu1 }
 0x6cc   : > { %v2967_v2 = vpop.f32.mrb[16].mxu0 }
 0x6cd   : > { %v1075_v5 = vpack.c.bf16 %v2967_v2, %v2965_v61  ;;  %v2170_v6 = vpop.f32.mrb[17].mxu0 }
 0x6ce   : > { %v1072_v7 = vpop.f32.mrb[18].mxu0 }
 0x6cf   : > { %v2171_v8 = vpop.f32.mrb[19].mxu0 }
 0x6d0   : > { %v1126_v9 = vpop.f32.mrb[16].mxu1 }
 0x6d1   : > { %v1182_v10 = vsel %vm726_vm5, -1e+09, %v1126_v9  ;;  %v2176_v12 = vpop.f32.mrb[17].mxu1 }
 0x6d2   : > { %v1129_v13 = vpop.f32.mrb[18].mxu1  ;;  %v1184_v15 = vsel %vm620_vm2, %v1182_v10, -inf }
 0x6d3   : > { %1185 = vmax.xlane.f32.xlu0 %v1184_v15  ;;  %v2177_v16 = vpop.f32.mrb[19].mxu1 }
 0x6d4   : > { %v1176_v17 = vpop.f32.mrb[20].mxu0 }
 0x6d5   : > { %v1183_v18 = vsel %vm727_vm6, -1e+09, %v1176_v17  ;;  %v2182_v19 = vpop.f32.mrb[21].mxu0 }
 0x6d6   : > { %v1179_v20 = vpop.f32.mrb[22].mxu0  ;;  %v1187_v21 = vsel %vm620_vm2, %v1183_v18, -inf }
 0x6d7   : > { %1188 = vmax.xlane.f32.xlu1 %v1187_v21  ;;  %v2183_v22 = vpop.f32.mrb[23].mxu0 }
 0x6e8   : > { %1208 = vrot.lane.b32.xlu1 %v2870_v11, %s2570_s29 }
 0x6ec   : > { %1313 = vrot.lane.b32.xlu1 %v2870_v11, %s2571_s20 }
 0x6f0   : > { %1363 = vrot.lane.b32.xlu1 %v2873_v14, %s2571_s20 }
 0x6f4   : > { %1361 = vrot.lane.b32.xlu1 %v2873_v14, %s2572_s14 }
 0x760   : > { %v1186_v23 = vpop.xlane.xlu0 %1185 }
 0x761   : > { %v1190_v24 = vsub.f32 %v1182_v10, %v1186_v23 }
 0x763   : > { %v1192_v25 = vmul.f32 1.442695, %v1190_v24 }
 0x764   : > { %v1189_v27 = vpop.xlane.xlu1 %1188 }
 0x765   : > { %2363 = vpow2.f32 %v1192_v25  ;;  %v1191_v29 = vsub.f32 %v1183_v18, %v1189_v27 }
 0x767   : > { %v1194_v30 = vmul.f32 1.442695, %v1191_v29 }
 0x768   : > { %v1209_v31 = vpop.permute.xlu1 %1208 }
 0x769   : > { %2365 = vpow2.f32 %v1194_v30  ;;  %v1214_v32 = vsel %vm759_vm7, %v1209_v31, 0 }
 0x76a   : > { %2185 = vmatpush3.bf16.msra.mxu1 %v1214_v32 }
 0x76b   : > { %2196 = vmatprep.subr.bf16.mxu1 %v2560_v0 }
 0x76c   : > { %v1314_v42 = vpop.permute.xlu1 %1313 }
 0x76d   : > { %v1319_v46 = vsel %vm620_vm2, %v1314_v42, 0 }
 0x76f   : > { %v2364_v33 = vpop.eup %2363 }
 0x770   : > { %v1196_v34 = vsel %vm620_vm2, %v2364_v33, 0.0  ;;  %v1364_v48 = vpop.permute.xlu1 %1363 }
 0x771   : > { %1197 = vadd.xlane.f32.xlu0 %v1196_v34  ;;  %v1369_v50 = vsel %vm620_vm2, %v1364_v48, 0 }
 0x773   : > { %v2366_v35 = vpop.eup %2365 }
 0x774   : > { %v1199_v36 = vsel %vm620_vm2, %v2366_v35, 0.0  ;;  %v1362_v52 = vpop.permute.xlu1 %1361 }
 0x775   : > { %1200 = vadd.xlane.f32.xlu0 %v1199_v36 }
 0x78b   : > { %1256 = vrot.lane.b32.xlu0 %v2873_v14, %s2570_s29 }
 0x78f   : > { %1311 = vrot.lane.b32.xlu0 %v2870_v11, %s2572_s14  ;;  %s3173_s14 = sld [smem:[#allocation15_spill]] }
 0x7fe   : > { %v1198_v37 = vpop.xlane.xlu0 %1197 }
 0x7ff   : > { %2367 = vrcp.f32 %v1198_v37  ;;  %v2339_v37 = vld [vmem:[#allocation6] sm:$0xff]  }
 0x802   : > { %v1201_v38 = vpop.xlane.xlu0 %1200 }
 0x803   : > { %2369 = vrcp.f32 %v1201_v38  ;;  %v2340_v38 = vld [vmem:[#allocation6 + $0x8] sm:$0xff]  }
 0x806   : > { %v1257_v39 = vpop.permute.xlu0 %1256 }
 0x807   : > { %v1262_v40 = vsel %vm759_vm7, %v1257_v39, 0 }
 0x808   : > { %2191 = vmatpush3.bf16.msra.mxu0 %v1262_v40 }
 0x809   : > { %v2368_v41 = vpop.eup %2367  ;;  %2202 = vmatprep.subr.bf16.mxu0 %v2560_v0 }
 0x80a   : > { %v1204_v43 = vmul.f32 %v2368_v41, %v2364_v33  ;;  %v1312_v51 = vpop.permute.xlu0 %1311 }
 0x80c   : > { %v1206_v44 = vpack.c.bf16 %v1204_v43, %v1204_v43 }
 0x80d   : > { %v2370_v45 = vpop.eup %2369 }
 0x80e   : > { %v1205_v47 = vmul.f32 %v2370_v45, %v2366_v35  ;;  %2187 = vmatmul.mubr.msk.bf16.vlgmr.msra.gmra.mrb[20].mxu1 %vm620_vm2, %v1206_v44 }
 0x80f   : > { %2197 = vmatpush3.bf16.xpose.msra.mxu1 %v1319_v46  ;;  %2198 = vmatprep.mubr.msk.bf16.mxu1 %vm2561_vm0, %v2560_v0 }
 0x810   : > { %v1207_v49 = vpack.c.bf16 %v1205_v47, %v1205_v47  ;;  %2208 = vmatprep.subr.bf16.mxu1 %v2560_v0 }
 0x812   : > { %2193 = vmatmul.mubr.msk.bf16.vlgmr.msra.gmra.mrb[24].mxu0 %vm620_vm2, %v1207_v49 }
 0x813   : > { %2203 = vmatpush3.bf16.xpose.msra.mxu0 %v1369_v50  ;;  %2204 = vmatprep.mubr.msk.bf16.mxu0 %vm2561_vm0, %v2560_v0  ;;  %v2045_v50 = vld [vmem:[%s3141_s5] ss:$0 sm:$0xff] }
 0x814   : > { %2214 = vmatprep.subr.bf16.mxu0 %v2560_v0 }
 0x816   : > { %2199 = vmatmul.mubr.msk.bf16.vlgmr.msra.gmra.mrb[24].mxu1 %vm620_vm2, %v1312_v51 }
 0x817   : > { %2210 = vmatprep.mubr.msk.bf16.mxu1 %vm2561_vm0, %v2560_v0 }
 0x81a   : > { %2205 = vmatmul.mubr.msk.bf16.vlgmr.msra.gmra.mrb[28].mxu0 %vm620_vm2, %v1362_v52 }
 0x81b   : > { %2216 = vmatprep.mubr.msk.bf16.mxu0 %vm2561_vm0, %v2560_v0 }
 0x8e1   : > { %v1250_v53 = vpop.f32.mrb[20].mxu1 }
 0x8e2   : > { %v2188_v54 = vpop.f32.mrb[21].mxu1 }
 0x8e3   : > { %v1253_v55 = vpop.f32.mrb[22].mxu1 }
 0x8e4   : > { %v2189_v56 = vpop.f32.mrb[23].mxu1 }
 0x8e5   : > { %v1298_v57 = vpop.f32.mrb[24].mxu0 }
 0x8e6   : > { %v1304_v58 = vpack.c.bf16 %v1298_v57, %v1250_v53  ;;  %v2194_v59 = vpop.f32.mrb[25].mxu0 }
 0x8e7   : > { %v1301_v60 = vpop.f32.mrb[26].mxu0 }
 0x8e8   : > { %v2195_v62 = vpop.f32.mrb[27].mxu0 }
 0x8e9   : > { %v1355_v63 = vpop.f32.mrb[24].mxu1 }
 0x8ea   : > { %v1411_v1 = vsel %vm726_vm5, -1e+09, %v1355_v63  ;;  %v2200_v6 = vpop.f32.mrb[25].mxu1 }
 0x8eb   : > { %v1358_v7 = vpop.f32.mrb[26].mxu1  ;;  %v1413_v8 = vsel %vm620_vm2, %v1411_v1, -inf }
 0x8ec   : > { %1414 = vmax.xlane.f32.xlu0 %v1413_v8  ;;  %v2201_v9 = vpop.f32.mrb[27].mxu1 }
 0x8ed   : > { %v1405_v10 = vpop.f32.mrb[28].mxu0 }
 0x8ee   : > { %v1412_v12 = vsel %vm727_vm6, -1e+09, %v1405_v10  ;;  %v2206_v13 = vpop.f32.mrb[29].mxu0 }
 0x8ef   : > { %v1408_v15 = vpop.f32.mrb[30].mxu0  ;;  %v1416_v16 = vsel %vm620_vm2, %v1412_v12, -inf  ;;  %v2341_v13 = vld [vmem:[#allocation8] sm:$0xff]  }
 0x8f0   : > { %1417 = vmax.xlane.f32.xlu1 %v1416_v16  ;;  %v2207_v17 = vpop.f32.mrb[31].mxu0  ;;  %v2343_v15 = vld [vmem:[%s3146_s10] sm:$0xff]   ;;  %v2344_v16 = vld [vmem:[%s3146_s10 + $0x8] sm:$0xff]  }
 0x901   : > { %1437 = vrot.lane.b32.xlu1 %v2870_v11, %s2573_s18 }
 0x905   : > { %1077 = vrot.lane.b32.xlu1 %v1075_v5, %s2574_s22 }
 0x909   : > { %1306 = vrot.lane.b32.xlu1 %v1304_v58, %s2575_s21 }
 0x979   : > { %v1415_v26 = vpop.xlane.xlu0 %1414 }
 0x97a   : > { %v1419_v28 = vsub.f32 %v1411_v1, %v1415_v26 }
 0x97c   : > { %v1421_v18 = vmul.f32 1.442695, %v1419_v28 }
 0x97d   : > { %v1418_v19 = vpop.xlane.xlu1 %1417 }
 0x97e   : > { %2371 = vpow2.f32 %v1421_v18  ;;  %v1420_v20 = vsub.f32 %v1412_v12, %v1418_v19 }
 0x980   : > { %v1423_v21 = vmul.f32 1.442695, %v1420_v20 }
 0x981   : > { %v1438_v22 = vpop.permute.xlu1 %1437 }
 0x982   : > { %2373 = vpow2.f32 %v1423_v21  ;;  %v1443_v23 = vsel %vm759_vm7, %v1438_v22, 0 }
 0x983   : > { %2209 = vmatpush3.bf16.msra.mxu1 %v1443_v23 }
 0x984   : > { %2220 = vmatprep.subr.bf16.mxu1 %v2560_v0 }
 0x985   : > { %v1078_v11 = vpop.permute.xlu1 %1077 }
 0x986   : > { %1081 = vst.msk [vmem:[#allocation2] sm:$0xff] %vm1080_vm8, %v1078_v11 }
 0x988   : > { %v2372_v61 = vpop.eup %2371 }
 0x989   : > { %v1307_v2 = vpop.permute.xlu1 %1306  ;;  %v1425_v5 = vsel %vm620_vm2, %v2372_v61, 0.0 }
 0x98a   : > { %1310 = vst.msk [vmem:[#allocation2] sm:$0xff] %vm1309_vm9, %v1307_v2  ;;  %1426 = vadd.xlane.f32.xlu0 %v1425_v5 }
 0x98c   : > { %v2374_v24 = vpop.eup %2373 }
 0x98d   : > { %v1428_v25 = vsel %vm620_vm2, %v2374_v24, 0.0 }
 0x98e   : > { %1429 = vadd.xlane.f32.xlu0 %v1428_v25 }
 0x9a4   : > { %1485 = vrot.lane.b32.xlu0 %v2873_v14, %s2573_s18  ;;  %s2022_s18 = sshll.u32 %s2826_s23, 4 }
 0x9a5   : > { %s530_s29 = scalar_lea.vmem [#allocation9], %s2022_s18  ;;  %s2577_s18 = smov [#allocation9]  }
 0x9a6   : > { %s1906_s20 = sshll.u32 %s530_s29, 4  ;;  %s2485_s11 = sshll.u32 %s2577_s18, 4  ;;  %s3090_s20 = int_to_ptr.vmem [resolvable:$true] %s1906_s20  ;;  %s2486_s11 = int_to_ptr.vmem [resolvable:$false] %s2485_s11 }
 0x9a7   : > { %s2481_s25 = scalar_lea.vmem %s3090_s20, 256  ;;  %p2488_p9 = scmp.lt.s32.totalorder %s3090_s20, %s2486_s11 }
 0x9a8   : > { %p2482_p0 = scmp.ne.s32.totalorder %s3090_s20, %s2481_s25 }
 0x9aa   : > { %p2483_p3 = pnand %p2482_p0, %p3177_p1 }
 0x9ac   : > { %p2484_p7 = pneg %p2483_p3 }
 0xa17   : > { %v1427_v27 = vpop.xlane.xlu0 %1426 }
 0xa18   : > { %2375 = vrcp.f32 %v1427_v27 }
 0xa1b   : > { %v1430_v29 = vpop.xlane.xlu0 %1429 }
 0xa1c   : > { %2377 = vrcp.f32 %v1430_v29 }
 0xa1f   : > { %v1486_v30 = vpop.permute.xlu0 %1485 }
 0xa20   : > { %v1491_v31 = vsel %vm759_vm7, %v1486_v30, 0  ;;  %v2049_v30 = vld [vmem:[%s3142_s6] ss:$0 sm:$0xff] }
 0xa21   : > { %2215 = vmatpush3.bf16.msra.mxu0 %v1491_v31 }
 0xa22   : > { %v2376_v32 = vpop.eup %2375  ;;  %2228 = vmatprep.subr.bf16.mxu0 %v2560_v0 }
 0xa23   : > { %v1433_v33 = vmul.f32 %v2376_v32, %v2372_v61 }
 0xa25   : > { %v1435_v34 = vpack.c.bf16 %v1433_v33, %v1433_v33 }
 0xa26   : > { %v2378_v35 = vpop.eup %2377 }
 0xa27   : > { %v1434_v36 = vmul.f32 %v2378_v35, %v2374_v24  ;;  %2211 = vmatmul.mubr.msk.bf16.vlgmr.msra.gmra.mrb[28].mxu1 %vm620_vm2, %v1435_v34  ;;  %v2050_v35 = vld [vmem:[%s3143_s7] ss:$0 sm:$0xff] }
 0xa28   : > { %2224 = vmatprep.mubr.msk.bf16.mxu1 %vm2561_vm0, %v2560_v0  ;;  %2221 = vmatpush3.bf16.msra.mxu1 %v2339_v37 }
 0xa29   : > { %v1436_v14 = vpack.c.bf16 %v1434_v36, %v1434_v36  ;;  %2222 = vmatprep.subr.bf16.mxu1 %v2560_v0 }
 0xa2b   : > { %2217 = vmatmul.mubr.msk.bf16.vlgmr.msra.gmra.mrb[32].mxu0 %vm620_vm2, %v1436_v14 }
 0xa2c   : > { %2232 = vmatprep.mubr.msk.bf16.mxu0 %vm2561_vm0, %v2560_v0  ;;  %2223 = vmatpush3.bf16.msra.mxu1 %v2340_v38 }
 0xa2d   : > { %2236 = vmatprep.subr.bf16.mxu1 %v2560_v0  ;;  %2229 = vmatpush3.bf16.msra.mxu0 %v2341_v13 }
 0xa2e   : > { %2230 = vmatprep.subr.bf16.mxu0 %v2560_v0 }
 0xafa   : > { %v1479_v39 = vpop.f32.mrb[28].mxu1 }
 0xafb   : > { %v2212_v40 = vpop.f32.mrb[29].mxu1 }
 0xafc   : > { %v1482_v41 = vpop.f32.mrb[30].mxu1  ;;  %v2346_v40 = vld [vmem:[%s3146_s10 + $0x18] sm:$0xff]  }
 0xafd   : > { %v2213_v42 = vpop.f32.mrb[31].mxu1  ;;  %v2051_v41 = vld [vmem:[%s3145_s9] ss:$0 sm:$0xff] }
 0xafe   : > { %v1527_v43 = vpop.f32.mrb[32].mxu0 }
 0xaff   : > { %v1533_v44 = vpack.c.bf16 %v1527_v43, %v1479_v39  ;;  %v2218_v45 = vpop.f32.mrb[33].mxu0  ;;  %v2345_v39 = vld [vmem:[%s3146_s10 + $0x10] sm:$0xff]  }
 0xb00   : > { %v1530_v46 = vpop.f32.mrb[34].mxu0 }
 0xb01   : > { %1535 = vrot.lane.b32.xlu0 %v1533_v44, %s2576_s26  ;;  %v2219_v47 = vpop.f32.mrb[35].mxu0  ;;  %s3176_s26 = sld [smem:[#allocation18_spill]] }
 0xb73   : > { %v1536_v48 = vpop.permute.xlu0 %1535 }
 0xb74   : > { %1539 = vst.msk [vmem:[#allocation2] sm:$0xff] %vm1538_vm10, %v1536_v48 }
 0xb7b   : > { %v1540_v49 = vld [vmem:[#allocation2] sm:$0xff] }
 0xb7c   : > { %2225 = vmatmul.mubr.msk.bf16.vlgmr.msra.gmra.mrb[32].mxu1 %vm566_vm1, %v1540_v49 }
 0xb7d   : > { %2244 = vmatprep.mubr.msk.bf16.mxu1 %vm2561_vm0, %v2560_v0  ;;  %2237 = vmatpush3.bf16.msra.mxu1 %v2343_v15 }
 0xb7e   : > { %2238 = vmatprep.subr.bf16.mxu1 %v2560_v0 }
 0xb81   : > { %2239 = vmatpush3.bf16.msra.mxu1 %v2344_v16 }
 0xb82   : > { %2240 = vmatprep.subr.bf16.mxu1 %v2560_v0 }
 0xb85   : > { %2241 = vmatpush3.bf16.msra.mxu1 %v2345_v39 }
 0xb86   : > { %2242 = vmatprep.subr.bf16.mxu1 %v2560_v0  ;;  %v2055_v0 = vld [vmem:[%s3173_s14] ss:$0 sm:$0xff] }
 0xb89   : > { %2243 = vmatpush3.bf16.msra.mxu1 %v2346_v40 }
 0xc4f   : > { %v1601_v51 = vpop.f32.mrb[32].mxu1 }
 0xc50   : > { %v1602_v52 = vadd.f32 %v2045_v50, %v1601_v51  ;;  %v2226_v53 = vpop.f32.mrb[33].mxu1 }
 0xc51   : > { %v1604_v54 = vpop.f32.mrb[34].mxu1 }
 0xc52   : > { %v1605_v55 = vadd.f32 %v2045_v50, %v1604_v54  ;;  %v2227_v56 = vpop.f32.mrb[35].mxu1  ;;  %v1610_v57 = vadd.f32 %v1602_v52, %v2856_v3 }
 0xc54   : > { %v1614_v58 = vsel %vm566_vm1, %v1610_v57, 0.0  ;;  %v1611_v59 = vadd.f32 %v1605_v55, %v2858_v4  ;;  %v2342_v4 = vld [vmem:[#allocation8 + $0x8] sm:$0xff]  }
 0xc55   : > { %1615 = vadd.xlane.f32.xlu1 %v1614_v58  ;;  %2231 = vmatpush3.bf16.msra.mxu0 %v2342_v4 }
 0xc56   : > { %v1617_v60 = vsel %vm566_vm1, %v1611_v59, 0.0 }
 0xc57   : > { %1618 = vadd.xlane.f32.xlu0 %v1617_v60 }
 0xce2   : > { %v1616_v62 = vpop.xlane.xlu1 %1615 }
 0xce3   : > { %v1621_v63 = vmul.f32 0.03125, %v1616_v62 }
 0xce4   : > { %v1619_v1 = vpop.xlane.xlu0 %1618 }
 0xce5   : > { %v1623_v6 = vsub.f32 %v1610_v57, %v1621_v63  ;;  %v1622_v7 = vmul.f32 0.03125, %v1619_v1 }
 0xce7   : > { %v1624_v8 = vsub.f32 %v1611_v59, %v1622_v7  ;;  %v1625_v9 = vmul.f32 %v1623_v6, %v1623_v6 }
 0xce9   : > { %v1627_v10 = vsel %vm566_vm1, %v1625_v9, 0.0  ;;  %v1626_v12 = vmul.f32 %v1624_v8, %v1624_v8 }
 0xcea   : > { %1628 = vadd.xlane.f32.xlu0 %v1627_v10 }
 0xceb   : > { %v1630_v3 = vsel %vm566_vm1, %v1626_v12, 0.0 }
 0xcec   : > { %1631 = vadd.xlane.f32.xlu1 %v1630_v3 }
 0xd77   : > { %v1629_v17 = vpop.xlane.xlu0 %1628 }
 0xd78   : > { %v1633_v26 = vmul.f32 0.032258064, %v1629_v17 }
 0xd79   : > { %v1632_v28 = vpop.xlane.xlu1 %1631 }
 0xd7a   : > { %2379 = vrsqrt.f32 %v1633_v26  ;;  %v1634_v18 = vmul.f32 0.032258064, %v1632_v28  ;;  %vm1637_vm11 = vcmp.eq.f32.partialorder %v1633_v26, inf  ;;  %v1640_v21 = vand.u32 2147483648, %v1633_v26 }
 0xd7b   : > { %vm1639_vm12 = vcmp.eq.f32.partialorder %v1633_v26, 0.0 }
 0xd7c   : > { %2381 = vrsqrt.f32 %v1634_v18  ;;  %vm1644_vm13 = vcmp.eq.f32.partialorder %v1634_v18, inf  ;;  %v1647_v5 = vand.u32 2147483648, %v1634_v18  ;;  %vm1646_vm14 = vcmp.eq.f32.partialorder %v1634_v18, 0.0 }
 0xd84   : > { %v2380_v19 = vpop.eup %2379 }
 0xd85   : > { %v1636_v20 = vmul.f32 %v2380_v19, %v1633_v26 }
 0xd86   : > { %v2382_v22 = vpop.eup %2381 }
 0xd87   : > { %v1638_v23 = vsel %vm1637_vm11, %v1633_v26, %v1636_v20  ;;  %v1643_v61 = vmul.f32 %v2382_v22, %v1634_v18 }
 0xd88   : > { %v1641_v11 = vsel %vm1639_vm12, %v1640_v21, %v1638_v23 }
 0xd89   : > { %v1649_v2 = vadd.f32 1e-06, %v1641_v11  ;;  %v1645_v24 = vsel %vm1644_vm13, %v1634_v18, %v1643_v61 }
 0xd8a   : > { %v1648_v25 = vsel %vm1646_vm14, %v1647_v5, %v1645_v24  ;;  %v2061_v24 = vld [vmem:[%s3174_s19] ss:$0 sm:$0xff]  ;;  %s3088_s19 = scalar_lea.hbm %s3176_s26, %s2069_s24 }
 0xd8b   : > { %2383 = vrcp.f32 %v1649_v2  ;;  %v1650_v27 = vadd.f32 1e-06, %v1648_v25 }
 0xd8d   : > { %2385 = vrcp.f32 %v1650_v27  ;;  %v2062_v27 = vld [vmem:[%s3175_s12] ss:$0 sm:$0xff]  ;;  %s2487_s12 = scalar_lea.vmem %s2486_s11, 512 }
 0xd8e   : > { %p2489_p12 = scmp.lt.s32.totalorder %s2487_s12, %s2481_s25 }
 0xd90   : > { %p2490_p2 = por %p2489_p12, %p2488_p9 }
 0xd92   : > { %p2491_p13 = pnand %p2490_p2, %p2484_p7 }
 0xd95   : > { %v2384_v29 = vpop.eup %2383 }
 0xd96   : > { %v1655_v31 = vmul.f32 %v2384_v29, %v1623_v6 }
 0xd97   : > { %v2386_v32 = vpop.eup %2385 }
 0xd98   : > { %v1656_v33 = vmul.f32 %v2386_v32, %v1624_v8  ;;  %v1663_v34 = vmul.f32 %v2049_v30, %v1655_v31 }
 0xd9a   : > { %v1664_v36 = vmul.f32 %v2049_v30, %v1656_v33  ;;  %v1671_v14 = vadd.f32 %v2050_v35, %v1663_v34 }
 0xd9c   : > { %v1672_v37 = vadd.f32 %v2050_v35, %v1664_v36 }
 0xd9e   : > { %v1673_v38 = vpack.c.bf16 %v1672_v37, %v1671_v14 }
 0xda0   : > { %2233 = vmatmul.mubr.msk.bf16.vlgmr.msra.gmra.mrb[36].mxu0 %vm566_vm1, %v1673_v38 }
 0xe73   : > { %v1734_v42 = vpop.f32.mrb[36].mxu0 }
 0xe74   : > { %v1735_v43 = vadd.f32 %v2051_v41, %v1734_v42  ;;  %v2234_v44 = vpop.f32.mrb[37].mxu0 }
 0xe75   : > { %v1737_v45 = vpop.f32.mrb[38].mxu0 }
 0xe76   : > { %v1738_v46 = vadd.f32 %v2051_v41, %v1737_v45  ;;  %v2235_v47 = vpop.f32.mrb[39].mxu0  ;;  %v1741_v48 = vmax.f32 %v1735_v43, 0.0 }
 0xe78   : > { %v1742_v49 = vmax.f32 %v1738_v46, 0.0 }
 0xe7a   : > { %v1743_v50 = vpack.c.bf16 %v1742_v49, %v1741_v48 }
 0xe7c   : > { %2245 = vmatmul.mubr.msk.bf16.vlgmr.msra.gmra.mrb[36].mxu1 %vm1783_vm15, %v1743_v50 }
 0xf4f   : > { %v1821_v51 = vpop.f32.mrb[36].mxu1 }
 0xf50   : > { %v1822_v52 = vadd.f32 %v2055_v0, %v1821_v51  ;;  %v2246_v53 = vpop.f32.mrb[37].mxu1 }
 0xf51   : > { %v1824_v54 = vpop.f32.mrb[38].mxu1 }
 0xf52   : > { %v1825_v55 = vadd.f32 %v2055_v0, %v1824_v54  ;;  %v2247_v56 = vpop.f32.mrb[39].mxu1  ;;  %v1828_v57 = vadd.f32 %v1822_v52, %v1671_v14 }
 0xf54   : > { %v1832_v58 = vsel %vm566_vm1, %v1828_v57, 0.0  ;;  %v1829_v59 = vadd.f32 %v1825_v55, %v1672_v37 }
 0xf55   : > { %1833 = vadd.xlane.f32.xlu0 %v1832_v58 }
 0xf56   : > { %v1835_v60 = vsel %vm566_vm1, %v1829_v59, 0.0 }
 0xf57   : > { %1836 = vadd.xlane.f32.xlu1 %v1835_v60 }
 0xfe2   : > { %v1834_v62 = vpop.xlane.xlu0 %1833 }
 0xfe3   : > { %v1838_v63 = vmul.f32 0.03125, %v1834_v62 }
 0xfe4   : > { %v1837_v1 = vpop.xlane.xlu1 %1836 }
 0xfe5   : > { %v1840_v6 = vsub.f32 %v1828_v57, %v1838_v63  ;;  %v1839_v7 = vmul.f32 0.03125, %v1837_v1 }
 0xfe7   : > { %v1841_v8 = vsub.f32 %v1829_v59, %v1839_v7  ;;  %v1842_v9 = vmul.f32 %v1840_v6, %v1840_v6 }
 0xfe9   : > { %v1844_v10 = vsel %vm566_vm1, %v1842_v9, 0.0  ;;  %v1843_v12 = vmul.f32 %v1841_v8, %v1841_v8 }
 0xfea   : > { %1845 = vadd.xlane.f32.xlu0 %v1844_v10 }
 0xfeb   : > { %v1847_v3 = vsel %vm566_vm1, %v1843_v12, 0.0 }
 0xfec   : > { %1848 = vadd.xlane.f32.xlu1 %v1847_v3 }
0x1077   : > { %v1846_v13 = vpop.xlane.xlu0 %1845 }
0x1078   : > { %v1850_v4 = vmul.f32 0.032258064, %v1846_v13 }
0x1079   : > { %v1849_v15 = vpop.xlane.xlu1 %1848 }
0x107a   : > { %2387 = vrsqrt.f32 %v1850_v4  ;;  %v1851_v16 = vmul.f32 0.032258064, %v1849_v15  ;;  %vm1854_vm0 = vcmp.eq.f32.partialorder %v1850_v4, inf  ;;  %v1857_v28 = vand.u32 2147483648, %v1850_v4 }
0x107b   : > { %vm1856_vm2 = vcmp.eq.f32.partialorder %v1850_v4, 0.0 }
0x107c   : > { %2389 = vrsqrt.f32 %v1851_v16  ;;  %vm1861_vm3 = vcmp.eq.f32.partialorder %v1851_v16, inf  ;;  %v1864_v23 = vand.u32 2147483648, %v1851_v16  ;;  %vm1863_vm4 = vcmp.eq.f32.partialorder %v1851_v16, 0.0 }
0x1084   : > { %v2388_v17 = vpop.eup %2387 }
0x1085   : > { %v1853_v26 = vmul.f32 %v2388_v17, %v1850_v4 }
0x1086   : > { %v2390_v18 = vpop.eup %2389 }
0x1087   : > { %v1855_v19 = vsel %vm1854_vm0, %v1850_v4, %v1853_v26  ;;  %v1860_v21 = vmul.f32 %v2390_v18, %v1851_v16 }
0x1088   : > { %v1858_v20 = vsel %vm1856_vm2, %v1857_v28, %v1855_v19 }
0x1089   : > { %v1866_v22 = vadd.f32 1e-06, %v1858_v20  ;;  %v1862_v11 = vsel %vm1861_vm3, %v1851_v16, %v1860_v21 }
0x108a   : > { %v1865_v61 = vsel %vm1863_vm4, %v1864_v23, %v1862_v11 }
0x108b   : > { %2391 = vrcp.f32 %v1866_v22  ;;  %v1867_v2 = vadd.f32 1e-06, %v1865_v61 }
0x108d   : > { %2393 = vrcp.f32 %v1867_v2 }
0x1095   : > { %v2392_v5 = vpop.eup %2391 }
0x1096   : > { %v1872_v25 = vmul.f32 %v2392_v5, %v1840_v6 }
0x1097   : > { %v2394_v29 = vpop.eup %2393 }
0x1098   : > { %v1880_v30 = vmul.f32 %v2061_v24, %v1872_v25  ;;  %v1873_v31 = vmul.f32 %v2394_v29, %v1841_v8 }
0x109a   : > { %v1888_v32 = vadd.f32 %v2062_v27, %v1880_v30  ;;  %v1881_v33 = vmul.f32 %v2061_v24, %v1873_v31 }
0x109c   : > { %1890 = vst.msk [vmem:[%s530_s29] sm:$0xff] %vm566_vm1, %v1888_v32  ;;  %v1889_v34 = vadd.f32 %v2062_v27, %v1881_v33 }
0x109e   : > { %1891 = vst.msk [vmem:[%s530_s29 + $0x8] sm:$0xff] %vm566_vm1, %v1889_v34 }
0x109f   : > { %2494 = shalt.err (!%p2491_p13)
}
0x10a0   : > { %s2495_s24 = scalar_lea.hbm %s3088_s19, 256  ;;  %s2499_s21 = scalar_lea.hbm %s3176_s26, 512 }
0x10a1   : > { %p2496_p6 = scmp.ne.s32.totalorder %s3088_s19, %s2495_s24  ;;  %p2500_p5 = scmp.lt.u32.totalorder %s3088_s19, %s3176_s26 }
0x10a2   : > { %p2501_p8 = scmp.lt.u32.totalorder %s2499_s21, %s2495_s24  ;;  %p2503_p0 = scmp.lt.u32.totalorder %s2495_s24, %s3088_s19 }
0x10a3   : > { %p2497_p10 = pnand %p2496_p6, %p3177_p1 }
0x10a4   : > { %p2502_p11 = por %p2501_p8, %p2500_p5 }
0x10a5   : > { %p2498_p4 = pneg %p2497_p10 }
0x10a6   : > { %p2504_p3 = por %p2503_p0, %p2502_p11 }
0x10a8   : > { %p2505_p7 = pnand %p2504_p3, %p2498_p4 }
0x10aa   : > { %2508 = shalt.err (!%p2505_p7)
}
0x10ab   : > { %s2578_s25 = smov 128  }
0x10ac   : > { %2258 = dma.vmem_to_hbm [thread:$0]  (%p3177_p1), %s3090_s20, 256, %s3088_s19, %s1893_s17, %s2578_s25, %s2578_s25, %s2574_s22  }
0x10ad PF: > { %s3178_s12 = sld [smem:[#allocation13_spill]]  ;;  %s3179_s29 = sld [smem:[#allocation14_spill]] }
0x10ae   : > { %p3181_p12 = scmp.ge.s32.totalorder %s2551_s16, 2 }
0x10b3   : > { %s1921_s14 = sand.u32 1, %s3178_s12   ;;  %p3180_p9 = scmp.ne.s32.totalorder %s3179_s29, 0 }
0x10b4   : > { %s1922_s24 = scalar_lea.sflag [#allocation5], %s1921_s14 }
0x10b5   : > { %p2272_p2 = pnand %p3181_p12, %p3180_p9 }
0x10b7   : > { %2534 = dma.done.wait (!%p2272_p2), %s1922_s24, 256  }
0x10b8   : > { %2536 = vsyncadd (!%p2272_p2), %s1922_s24, 4294967040  ;;  %p28_p13 = scmp.ge.s32.totalorder %s2764_s13, 4   ;;  %s3182_s29 = smov %s2543_s30 }
0x10b9   : > { %s3183_s30 = smov %s2547_s15  ;;  %s3184_s15 = smov %s2780_s28 }
0x10ba   : > { %s3185_s16 = smov %s2764_s13  ;;  %30 = sbr.rel (!%p28_p13) target bundleno = 11 (0xb), region = 132 }
0x10c1   :  { %1927 = vsyncpa [#allocation4], 1 }
0x10c2   :  { %1929 = vsyncpa [#allocation4 + $0x1], 1 }
0x10c3   :  { %1930 = vsyncpa [#allocation7], 1 }
0x10c4   :  { %1931 = vsyncpa [#allocation5], 1 }
0x10c5   :  { %1933 = vsyncpa [#allocation5 + $0x1], 1 }

</bundles_post_ra>
